<compile_context>
chip_gen: v7x
topology: tpu7x:2x2x1
jax: 0.10.0
libtpu: 0.0.40
codegen_flags: <defaults>
</compile_context>

<pallas_src>
import jax
import jax.numpy as jnp
import numpy as np
from jax.experimental import pallas as pl
from jax.experimental.pallas import tpu as pltpu

KH = KW = 3          # both convs are 3x3, stride 1, no padding
NTAP = KH * KW       # 9 deformable kernel taps


def _deform_kernel(colsT_ref, xw_ref, w1p_ref, b1p_ref, b2_ref, out_ref):
    """One batch element per grid step.

    colsT_ref : (1, Cin*9, PPAD)     im2col of x (zero-padded lanes), row c*9+i*3+j
    xw_ref    : (1, 9, Cout*H, W)    xw[k, o*H+y, x] = sum_c w2[o,c,k] * x[c,y,x]
    w1p_ref   : (18, Cin*9)          offset-conv weight, rows 0..8 = dy, 9..17 = dx
    b1p_ref   : (18, 1)              offset-conv bias (same permutation)
    b2_ref    : (Cout, 1)            deform-conv bias
    out_ref   : (1, Cout, PPAD)      lane-dense output (flat output positions on lanes)
    """
    cout = out_ref.shape[1]
    ppad = out_ref.shape[2]
    ch = xw_ref.shape[2]
    w = xw_ref.shape[3]
    h = ch // cout
    ow = w - KW + 1                                # output width of both convs

    # ---- offset conv (conv1) as a single lane-dense matmul ----
    cols = colsT_ref[0]                                              # (27, PPAD)
    off = jnp.dot(w1p_ref[...], cols,
                  preferred_element_type=jnp.float32) + b1p_ref[...]  # (18, PPAD)

    # ---- coordinate grids, generated in-kernel (no lane-sparse inputs) ----
    pidx = jax.lax.broadcasted_iota(jnp.int32, (1, ppad), 1).astype(jnp.float32)
    # exact integer floor-div by OW for small integers (the +0.5 guards 1-ulp error)
    gy = jnp.floor((pidx + 0.5) * (1.0 / float(ow)))                 # (1, PPAD) = oh
    gx = pidx - gy * float(ow)                                       # (1, PPAD) = ow
    ycol = jax.lax.broadcasted_iota(jnp.int32, (h, 1), 0).astype(jnp.float32)
    xcol = jax.lax.broadcasted_iota(jnp.int32, (w, 1), 0).astype(jnp.float32)

    acc = jnp.zeros((cout, ppad), jnp.float32)

    # ---- separable bilinear sampling, one tap at a time ----
    # relu(1-|py-Y|)*relu(1-|px-X|) is nonzero only at the 4 bilinear corners and
    # is 0 for corners outside the image => torchvision's zero-padded sampling.
    for k in range(NTAP):
        i, j = k // KW, k % KW
        dy = off[k:k + 1, :]                                         # (1, PPAD)
        dx = off[NTAP + k:NTAP + k + 1, :]                           # (1, PPAD)
        py = gy + float(i) + dy                                      # sampling y
        px = gx + float(j) + dx                                      # sampling x
        wy = jnp.maximum(1.0 - jnp.abs(py - ycol), 0.0)              # (H, PPAD)
        wx = jnp.maximum(1.0 - jnp.abs(px - xcol), 0.0)              # (W, PPAD)
        # contract the x-axis on the MXU: m[o*H+y, p] = sum_x xw_k[o,y,x]*wx[x,p]
        m = jnp.dot(xw_ref[0, k], wx,
                    preferred_element_type=jnp.float32)              # (Cout*H, PPAD)
        m3 = m.reshape(cout, h, ppad)
        # weight by wy and reduce over y (sublane reduce, XLU/VPU side work)
        acc = acc + jnp.sum(m3 * wy[None, :, :], axis=1)             # (Cout, PPAD)

    out_ref[0] = acc + b2_ref[...]


def model_forward(x, w1, b1, w2, b2):
    """x: (N, Cin, H, W) float32.  Returns (N, Cout, H-2, W-2) float32 (NCHW)."""
    N, Cin, H, W = x.shape
    OH, OW = H - KH + 1, W - KW + 1
    P = OH * OW
    PPAD = ((P + 127) // 128) * 128          # lane-dense padding (196 -> 256)
    Coff = w1.shape[0]                       # 2 * KH * KW = 18
    Cout = w2.shape[0]                       # 3
    CKK = Cin * KH * KW                      # 27

    # ---------- glue: pure data movement / parameter re-layout ----------
    # im2col, transposed + zero-padded lanes: (N, CKK, PPAD); column p = oh*OW+ow.
    patches = []
    for c in range(Cin):
        for i in range(KH):
            for j in range(KW):
                patches.append(x[:, c, i:i + OH, j:j + OW].reshape(N, P))
    colsT = jnp.stack(patches, axis=1)                               # (N, CKK, P)
    colsT = jnp.pad(colsT, ((0, 0), (0, 0), (0, PPAD - P)))          # (N, CKK, PPAD)

    # Offset-conv params with channel permutation: rows 0..8 -> dy, 9..17 -> dx.
    perm = np.array(list(range(0, Coff, 2)) + list(range(1, Coff, 2)))
    w1p = w1.reshape(Coff, CKK)[perm]                                # (18, CKK)
    b1p = b1[perm].reshape(Coff, 1)                                  # (18, 1)

    # Fold the deform-conv weights into the image once per tap:
    #   xw[n, k, o*H + y, x] = sum_c w2[o, c, k] * x[n, c, y, x]
    w2r = w2.reshape(Cout, Cin, NTAP)                                # [o, c, k]
    xw = jnp.einsum("ock,nchw->nkohw", w2r, x).reshape(N, NTAP, Cout * H, W)
    b2r = b2.reshape(Cout, 1)

    out = pl.pallas_call(
        _deform_kernel,
        out_shape=jax.ShapeDtypeStruct((N, Cout, PPAD), jnp.float32),
        grid=(N,),
        in_specs=[
            pl.BlockSpec((1, CKK, PPAD), lambda n: (n, 0, 0)),
            pl.BlockSpec((1, NTAP, Cout * H, W), lambda n: (n, 0, 0, 0)),
            pl.BlockSpec((Coff, CKK), lambda n: (0, 0)),
            pl.BlockSpec((Coff, 1), lambda n: (0, 0)),
            pl.BlockSpec((Cout, 1), lambda n: (0, 0)),
        ],
        out_specs=pl.BlockSpec((1, Cout, PPAD), lambda n: (n, 0, 0)),
        compiler_params=pltpu.CompilerParams(dimension_semantics=("parallel",)),
    )(colsT, xw, w1p, b1p, b2r)

    # Crop padded lanes, reshape to NCHW.
    return out[:, :, :P].reshape(N, Cout, OH, OW)


def reference_forward(x, w1, b1, w2, b2):
    """Pure-JAX reference (dense zero-padded bilinear, independent op ordering)."""
    N, Cin, H, W = x.shape
    OH, OW = H - KH + 1, W - KW + 1
    off = jax.lax.conv_general_dilated(
        x, w1, (1, 1), "VALID",
        dimension_numbers=("NCHW", "OIHW", "NCHW")) + b1.reshape(1, -1, 1, 1)
    hh = jnp.arange(OH, dtype=jnp.float32).reshape(OH, 1)
    ww = jnp.arange(OW, dtype=jnp.float32).reshape(1, OW)
    Ys = jnp.arange(H, dtype=jnp.float32)
    Xs = jnp.arange(W, dtype=jnp.float32)
    out = jnp.zeros((N, w2.shape[0], OH, OW), jnp.float32)
    for k in range(KH * KW):
        i, j = k // KW, k % KW
        py = hh + i + off[:, 2 * k]                               # (N, OH, OW)
        px = ww + j + off[:, 2 * k + 1]
        wy = jnp.maximum(1.0 - jnp.abs(py[..., None] - Ys), 0.0)  # (N,OH,OW,H)
        wx = jnp.maximum(1.0 - jnp.abs(px[..., None] - Xs), 0.0)  # (N,OH,OW,W)
        samp = jnp.einsum("ncab,nhwa,nhwb->nchw", x, wy, wx)
        out = out + jnp.einsum("oc,nchw->nohw", w2[:, :, i, j], samp)
    return out + b2.reshape(1, -1, 1, 1)


if __name__ == "__main__":
    key = jax.random.PRNGKey(0)
    k1, k2, k3, k4, k5 = jax.random.split(key, 5)

    N, Cin, H, W = 2, 3, 16, 16
    Coff = 2 * KH * KW    # 18, as produced by conv1
    Cout = 3

    # Deterministic synthetic parameters (module __init__ shapes).
    w1 = 0.1 * jax.random.normal(k1, (Coff, Cin, KH, KW), dtype=jnp.float32)
    b1 = 0.05 * jax.random.normal(k2, (Coff,), dtype=jnp.float32)
    w2 = (1.0 / np.sqrt(Cin * KH * KW)) * jax.random.normal(
        k3, (Cout, Cin, KH, KW), dtype=jnp.float32)
    b2 = 0.1 * jax.random.normal(k4, (Cout,), dtype=jnp.float32)

    x = jax.random.normal(k5, (N, Cin, H, W), dtype=jnp.float32)

    y = model_forward(x, w1, b1, w2, b2)
    y = jax.block_until_ready(y)

    y_ref = jax.block_until_ready(reference_forward(x, w1, b1, w2, b2))
    assert y.shape == (N, Cout, H - 2, W - 2)
    np.testing.assert_allclose(np.asarray(y), np.asarray(y_ref),
                               rtol=1e-3, atol=1e-3)

    print("KERNEL_OK")
</pallas_src>

<mosaic_0001>
module attributes {stable_mosaic.version = 11 : i64} {
  func.func @_deform_kernel(%arg0: i32, %arg1: memref<1x27x256xf32, #tpu.memory_space<vmem>>, %arg2: memref<1x9x48x16xf32, #tpu.memory_space<vmem>>, %arg3: memref<18x27xf32, #tpu.memory_space<vmem>>, %arg4: memref<18x1xf32, #tpu.memory_space<vmem>>, %arg5: memref<3x1xf32, #tpu.memory_space<vmem>>, %arg6: memref<1x3x256xf32, #tpu.memory_space<vmem>>) attributes {dimension_semantics = [#tpu.dimension_semantics<parallel>], iteration_bounds = array<i64: 2>, scalar_prefetch = 0 : i64, scratch_operands = 0 : i64, tpu.core_type = #tpu.core_type<tc>, window_params = [{transform_indices = @transform_0, window_bounds = array<i64: 1, 27, 256>}, {transform_indices = @transform_1, window_bounds = array<i64: 1, 9, 48, 16>}, {pipeline_mode = #tpu.pipeline_mode<synchronous>, transform_indices = @transform_2, window_bounds = array<i64: 18, 27>}, {pipeline_mode = #tpu.pipeline_mode<synchronous>, transform_indices = @transform_3, window_bounds = array<i64: 18, 1>}, {pipeline_mode = #tpu.pipeline_mode<synchronous>, transform_indices = @transform_4, window_bounds = array<i64: 3, 1>}, {transform_indices = @transform_5, window_bounds = array<i64: 1, 3, 256>}]} {
    %c0 = arith.constant 0 : index
    %c0_0 = arith.constant 0 : index
    %c0_1 = arith.constant 0 : index
    %0 = vector.load %arg1[%c0, %c0_0, %c0_1] : memref<1x27x256xf32, #tpu.memory_space<vmem>>, vector<1x27x256xf32>
    %1 = vector.shape_cast %0 : vector<1x27x256xf32> to vector<27x256xf32>
    %c0_2 = arith.constant 0 : index
    %c0_3 = arith.constant 0 : index
    %2 = vector.load %arg3[%c0_2, %c0_3] : memref<18x27xf32, #tpu.memory_space<vmem>>, vector<18x27xf32>
    %cst = arith.constant dense<0.000000e+00> : vector<18x256xf32>
    %3 = tpu.matmul %2, %1, %cst {dimension_numbers = #tpu.dot_dimension_numbers<[1], [0], [0], [1], [0, 0, 1, 1], [], []>} : vector<18x27xf32>, vector<27x256xf32>, vector<18x256xf32> -> vector<18x256xf32>
    %c0_4 = arith.constant 0 : index
    %c0_5 = arith.constant 0 : index
    %4 = vector.load %arg4[%c0_4, %c0_5] : memref<18x1xf32, #tpu.memory_space<vmem>>, vector<18x1xf32>
    %5 = vector.broadcast %4 : vector<18x1xf32> to vector<18x256xf32>
    %6 = arith.addf %3, %5 : vector<18x256xf32>
    %7 = tpu.iota {dimensions = array<i32: 1>} : vector<1x256xi32>
    %8 = arith.sitofp %7 : vector<1x256xi32> to vector<1x256xf32>
    %cst_6 = arith.constant 5.000000e-01 : f32
    %9 = vector.broadcast %cst_6 : f32 to vector<1x256xf32>
    %10 = arith.addf %8, %9 : vector<1x256xf32>
    %cst_7 = arith.constant 0.0714285746 : f32
    %11 = vector.broadcast %cst_7 : f32 to vector<1x256xf32>
    %12 = arith.mulf %10, %11 : vector<1x256xf32>
    %13 = math.floor %12 : vector<1x256xf32>
    %cst_8 = arith.constant 1.400000e+01 : f32
    %14 = vector.broadcast %cst_8 : f32 to vector<1x256xf32>
    %15 = arith.mulf %13, %14 : vector<1x256xf32>
    %16 = arith.subf %8, %15 : vector<1x256xf32>
    %17 = tpu.iota {dimensions = array<i32: 0>} : vector<16x1xi32>
    %18 = arith.sitofp %17 : vector<16x1xi32> to vector<16x1xf32>
    %19 = tpu.iota {dimensions = array<i32: 0>} : vector<16x1xi32>
    %20 = arith.sitofp %19 : vector<16x1xi32> to vector<16x1xf32>
    %cst_9 = arith.constant 0.000000e+00 : f32
    %21 = vector.broadcast %cst_9 : f32 to vector<3x256xf32>
    %22 = vector.extract_strided_slice %6 {offsets = [0, 0], sizes = [1, 256], strides = [1, 1]} : vector<18x256xf32> to vector<1x256xf32>
    %23 = vector.extract_strided_slice %6 {offsets = [9, 0], sizes = [1, 256], strides = [1, 1]} : vector<18x256xf32> to vector<1x256xf32>
    %cst_10 = arith.constant 0.000000e+00 : f32
    %24 = vector.broadcast %cst_10 : f32 to vector<1x256xf32>
    %25 = arith.addf %13, %24 : vector<1x256xf32>
    %26 = arith.addf %25, %22 : vector<1x256xf32>
    %cst_11 = arith.constant 0.000000e+00 : f32
    %27 = vector.broadcast %cst_11 : f32 to vector<1x256xf32>
    %28 = arith.addf %16, %27 : vector<1x256xf32>
    %29 = arith.addf %28, %23 : vector<1x256xf32>
    %30 = vector.broadcast %26 : vector<1x256xf32> to vector<16x256xf32>
    %31 = vector.broadcast %18 : vector<16x1xf32> to vector<16x256xf32>
    %32 = arith.subf %30, %31 : vector<16x256xf32>
    %33 = math.absf %32 : vector<16x256xf32>
    %cst_12 = arith.constant 1.000000e+00 : f32
    %34 = vector.broadcast %cst_12 : f32 to vector<16x256xf32>
    %35 = arith.subf %34, %33 : vector<16x256xf32>
    %cst_13 = arith.constant 0.000000e+00 : f32
    %36 = vector.broadcast %cst_13 : f32 to vector<16x256xf32>
    %37 = arith.maximumf %35, %36 : vector<16x256xf32>
    %38 = vector.broadcast %29 : vector<1x256xf32> to vector<16x256xf32>
    %39 = vector.broadcast %20 : vector<16x1xf32> to vector<16x256xf32>
    %40 = arith.subf %38, %39 : vector<16x256xf32>
    %41 = math.absf %40 : vector<16x256xf32>
    %cst_14 = arith.constant 1.000000e+00 : f32
    %42 = vector.broadcast %cst_14 : f32 to vector<16x256xf32>
    %43 = arith.subf %42, %41 : vector<16x256xf32>
    %cst_15 = arith.constant 0.000000e+00 : f32
    %44 = vector.broadcast %cst_15 : f32 to vector<16x256xf32>
    %45 = arith.maximumf %43, %44 : vector<16x256xf32>
    %c0_16 = arith.constant 0 : index
    %c0_17 = arith.constant 0 : index
    %c0_18 = arith.constant 0 : index
    %c0_19 = arith.constant 0 : index
    %46 = vector.load %arg2[%c0_16, %c0_17, %c0_18, %c0_19] : memref<1x9x48x16xf32, #tpu.memory_space<vmem>>, vector<1x1x48x16xf32>
    %47 = vector.shape_cast %46 : vector<1x1x48x16xf32> to vector<48x16xf32>
    %cst_20 = arith.constant dense<0.000000e+00> : vector<48x256xf32>
    %48 = tpu.matmul %47, %45, %cst_20 {dimension_numbers = #tpu.dot_dimension_numbers<[1], [0], [0], [1], [0, 0, 1, 1], [], []>} : vector<48x16xf32>, vector<16x256xf32>, vector<48x256xf32> -> vector<48x256xf32>
    %49 = vector.shape_cast %48 : vector<48x256xf32> to vector<3x16x256xf32>
    %50 = vector.shape_cast %37 : vector<16x256xf32> to vector<1x16x256xf32>
    %51 = vector.broadcast %50 : vector<1x16x256xf32> to vector<3x16x256xf32>
    %52 = arith.mulf %49, %51 : vector<3x16x256xf32>
    %cst_21 = arith.constant dense<0.000000e+00> : vector<3x256xf32>
    %53 = vector.multi_reduction <add>, %52, %cst_21 [1] : vector<3x16x256xf32> to vector<3x256xf32>
    %54 = arith.addf %21, %53 : vector<3x256xf32>
    %55 = vector.extract_strided_slice %6 {offsets = [1, 0], sizes = [1, 256], strides = [1, 1]} : vector<18x256xf32> to vector<1x256xf32>
    %56 = vector.extract_strided_slice %6 {offsets = [10, 0], sizes = [1, 256], strides = [1, 1]} : vector<18x256xf32> to vector<1x256xf32>
    %cst_22 = arith.constant 0.000000e+00 : f32
    %57 = vector.broadcast %cst_22 : f32 to vector<1x256xf32>
    %58 = arith.addf %13, %57 : vector<1x256xf32>
    %59 = arith.addf %58, %55 : vector<1x256xf32>
    %cst_23 = arith.constant 1.000000e+00 : f32
    %60 = vector.broadcast %cst_23 : f32 to vector<1x256xf32>
    %61 = arith.addf %16, %60 : vector<1x256xf32>
    %62 = arith.addf %61, %56 : vector<1x256xf32>
    %63 = vector.broadcast %59 : vector<1x256xf32> to vector<16x256xf32>
    %64 = vector.broadcast %18 : vector<16x1xf32> to vector<16x256xf32>
    %65 = arith.subf %63, %64 : vector<16x256xf32>
    %66 = math.absf %65 : vector<16x256xf32>
    %cst_24 = arith.constant 1.000000e+00 : f32
    %67 = vector.broadcast %cst_24 : f32 to vector<16x256xf32>
    %68 = arith.subf %67, %66 : vector<16x256xf32>
    %cst_25 = arith.constant 0.000000e+00 : f32
    %69 = vector.broadcast %cst_25 : f32 to vector<16x256xf32>
    %70 = arith.maximumf %68, %69 : vector<16x256xf32>
    %71 = vector.broadcast %62 : vector<1x256xf32> to vector<16x256xf32>
    %72 = vector.broadcast %20 : vector<16x1xf32> to vector<16x256xf32>
    %73 = arith.subf %71, %72 : vector<16x256xf32>
    %74 = math.absf %73 : vector<16x256xf32>
    %cst_26 = arith.constant 1.000000e+00 : f32
    %75 = vector.broadcast %cst_26 : f32 to vector<16x256xf32>
    %76 = arith.subf %75, %74 : vector<16x256xf32>
    %cst_27 = arith.constant 0.000000e+00 : f32
    %77 = vector.broadcast %cst_27 : f32 to vector<16x256xf32>
    %78 = arith.maximumf %76, %77 : vector<16x256xf32>
    %c0_28 = arith.constant 0 : index
    %c1 = arith.constant 1 : index
    %c0_29 = arith.constant 0 : index
    %c0_30 = arith.constant 0 : index
    %79 = vector.load %arg2[%c0_28, %c1, %c0_29, %c0_30] : memref<1x9x48x16xf32, #tpu.memory_space<vmem>>, vector<1x1x48x16xf32>
    %80 = vector.shape_cast %79 : vector<1x1x48x16xf32> to vector<48x16xf32>
    %cst_31 = arith.constant dense<0.000000e+00> : vector<48x256xf32>
    %81 = tpu.matmul %80, %78, %cst_31 {dimension_numbers = #tpu.dot_dimension_numbers<[1], [0], [0], [1], [0, 0, 1, 1], [], []>} : vector<48x16xf32>, vector<16x256xf32>, vector<48x256xf32> -> vector<48x256xf32>
    %82 = vector.shape_cast %81 : vector<48x256xf32> to vector<3x16x256xf32>
    %83 = vector.shape_cast %70 : vector<16x256xf32> to vector<1x16x256xf32>
    %84 = vector.broadcast %83 : vector<1x16x256xf32> to vector<3x16x256xf32>
    %85 = arith.mulf %82, %84 : vector<3x16x256xf32>
    %cst_32 = arith.constant dense<0.000000e+00> : vector<3x256xf32>
    %86 = vector.multi_reduction <add>, %85, %cst_32 [1] : vector<3x16x256xf32> to vector<3x256xf32>
    %87 = arith.addf %54, %86 : vector<3x256xf32>
    %88 = vector.extract_strided_slice %6 {offsets = [2, 0], sizes = [1, 256], strides = [1, 1]} : vector<18x256xf32> to vector<1x256xf32>
    %89 = vector.extract_strided_slice %6 {offsets = [11, 0], sizes = [1, 256], strides = [1, 1]} : vector<18x256xf32> to vector<1x256xf32>
    %cst_33 = arith.constant 0.000000e+00 : f32
    %90 = vector.broadcast %cst_33 : f32 to vector<1x256xf32>
    %91 = arith.addf %13, %90 : vector<1x256xf32>
    %92 = arith.addf %91, %88 : vector<1x256xf32>
    %cst_34 = arith.constant 2.000000e+00 : f32
    %93 = vector.broadcast %cst_34 : f32 to vector<1x256xf32>
    %94 = arith.addf %16, %93 : vector<1x256xf32>
    %95 = arith.addf %94, %89 : vector<1x256xf32>
    %96 = vector.broadcast %92 : vector<1x256xf32> to vector<16x256xf32>
    %97 = vector.broadcast %18 : vector<16x1xf32> to vector<16x256xf32>
    %98 = arith.subf %96, %97 : vector<16x256xf32>
    %99 = math.absf %98 : vector<16x256xf32>
    %cst_35 = arith.constant 1.000000e+00 : f32
    %100 = vector.broadcast %cst_35 : f32 to vector<16x256xf32>
    %101 = arith.subf %100, %99 : vector<16x256xf32>
    %cst_36 = arith.constant 0.000000e+00 : f32
    %102 = vector.broadcast %cst_36 : f32 to vector<16x256xf32>
    %103 = arith.maximumf %101, %102 : vector<16x256xf32>
    %104 = vector.broadcast %95 : vector<1x256xf32> to vector<16x256xf32>
    %105 = vector.broadcast %20 : vector<16x1xf32> to vector<16x256xf32>
    %106 = arith.subf %104, %105 : vector<16x256xf32>
    %107 = math.absf %106 : vector<16x256xf32>
    %cst_37 = arith.constant 1.000000e+00 : f32
    %108 = vector.broadcast %cst_37 : f32 to vector<16x256xf32>
    %109 = arith.subf %108, %107 : vector<16x256xf32>
    %cst_38 = arith.constant 0.000000e+00 : f32
    %110 = vector.broadcast %cst_38 : f32 to vector<16x256xf32>
    %111 = arith.maximumf %109, %110 : vector<16x256xf32>
    %c0_39 = arith.constant 0 : index
    %c2 = arith.constant 2 : index
    %c0_40 = arith.constant 0 : index
    %c0_41 = arith.constant 0 : index
    %112 = vector.load %arg2[%c0_39, %c2, %c0_40, %c0_41] : memref<1x9x48x16xf32, #tpu.memory_space<vmem>>, vector<1x1x48x16xf32>
    %113 = vector.shape_cast %112 : vector<1x1x48x16xf32> to vector<48x16xf32>
    %cst_42 = arith.constant dense<0.000000e+00> : vector<48x256xf32>
    %114 = tpu.matmul %113, %111, %cst_42 {dimension_numbers = #tpu.dot_dimension_numbers<[1], [0], [0], [1], [0, 0, 1, 1], [], []>} : vector<48x16xf32>, vector<16x256xf32>, vector<48x256xf32> -> vector<48x256xf32>
    %115 = vector.shape_cast %114 : vector<48x256xf32> to vector<3x16x256xf32>
    %116 = vector.shape_cast %103 : vector<16x256xf32> to vector<1x16x256xf32>
    %117 = vector.broadcast %116 : vector<1x16x256xf32> to vector<3x16x256xf32>
    %118 = arith.mulf %115, %117 : vector<3x16x256xf32>
    %cst_43 = arith.constant dense<0.000000e+00> : vector<3x256xf32>
    %119 = vector.multi_reduction <add>, %118, %cst_43 [1] : vector<3x16x256xf32> to vector<3x256xf32>
    %120 = arith.addf %87, %119 : vector<3x256xf32>
    %121 = vector.extract_strided_slice %6 {offsets = [3, 0], sizes = [1, 256], strides = [1, 1]} : vector<18x256xf32> to vector<1x256xf32>
    %122 = vector.extract_strided_slice %6 {offsets = [12, 0], sizes = [1, 256], strides = [1, 1]} : vector<18x256xf32> to vector<1x256xf32>
    %cst_44 = arith.constant 1.000000e+00 : f32
    %123 = vector.broadcast %cst_44 : f32 to vector<1x256xf32>
    %124 = arith.addf %13, %123 : vector<1x256xf32>
    %125 = arith.addf %124, %121 : vector<1x256xf32>
    %cst_45 = arith.constant 0.000000e+00 : f32
    %126 = vector.broadcast %cst_45 : f32 to vector<1x256xf32>
    %127 = arith.addf %16, %126 : vector<1x256xf32>
    %128 = arith.addf %127, %122 : vector<1x256xf32>
    %129 = vector.broadcast %125 : vector<1x256xf32> to vector<16x256xf32>
    %130 = vector.broadcast %18 : vector<16x1xf32> to vector<16x256xf32>
    %131 = arith.subf %129, %130 : vector<16x256xf32>
    %132 = math.absf %131 : vector<16x256xf32>
    %cst_46 = arith.constant 1.000000e+00 : f32
    %133 = vector.broadcast %cst_46 : f32 to vector<16x256xf32>
    %134 = arith.subf %133, %132 : vector<16x256xf32>
    %cst_47 = arith.constant 0.000000e+00 : f32
    %135 = vector.broadcast %cst_47 : f32 to vector<16x256xf32>
    %136 = arith.maximumf %134, %135 : vector<16x256xf32>
    %137 = vector.broadcast %128 : vector<1x256xf32> to vector<16x256xf32>
    %138 = vector.broadcast %20 : vector<16x1xf32> to vector<16x256xf32>
    %139 = arith.subf %137, %138 : vector<16x256xf32>
    %140 = math.absf %139 : vector<16x256xf32>
    %cst_48 = arith.constant 1.000000e+00 : f32
    %141 = vector.broadcast %cst_48 : f32 to vector<16x256xf32>
    %142 = arith.subf %141, %140 : vector<16x256xf32>
    %cst_49 = arith.constant 0.000000e+00 : f32
    %143 = vector.broadcast %cst_49 : f32 to vector<16x256xf32>
    %144 = arith.maximumf %142, %143 : vector<16x256xf32>
    %c0_50 = arith.constant 0 : index
    %c3 = arith.constant 3 : index
    %c0_51 = arith.constant 0 : index
    %c0_52 = arith.constant 0 : index
    %145 = vector.load %arg2[%c0_50, %c3, %c0_51, %c0_52] : memref<1x9x48x16xf32, #tpu.memory_space<vmem>>, vector<1x1x48x16xf32>
    %146 = vector.shape_cast %145 : vector<1x1x48x16xf32> to vector<48x16xf32>
    %cst_53 = arith.constant dense<0.000000e+00> : vector<48x256xf32>
    %147 = tpu.matmul %146, %144, %cst_53 {dimension_numbers = #tpu.dot_dimension_numbers<[1], [0], [0], [1], [0, 0, 1, 1], [], []>} : vector<48x16xf32>, vector<16x256xf32>, vector<48x256xf32> -> vector<48x256xf32>
    %148 = vector.shape_cast %147 : vector<48x256xf32> to vector<3x16x256xf32>
    %149 = vector.shape_cast %136 : vector<16x256xf32> to vector<1x16x256xf32>
    %150 = vector.broadcast %149 : vector<1x16x256xf32> to vector<3x16x256xf32>
    %151 = arith.mulf %148, %150 : vector<3x16x256xf32>
    %cst_54 = arith.constant dense<0.000000e+00> : vector<3x256xf32>
    %152 = vector.multi_reduction <add>, %151, %cst_54 [1] : vector<3x16x256xf32> to vector<3x256xf32>
    %153 = arith.addf %120, %152 : vector<3x256xf32>
    %154 = vector.extract_strided_slice %6 {offsets = [4, 0], sizes = [1, 256], strides = [1, 1]} : vector<18x256xf32> to vector<1x256xf32>
    %155 = vector.extract_strided_slice %6 {offsets = [13, 0], sizes = [1, 256], strides = [1, 1]} : vector<18x256xf32> to vector<1x256xf32>
    %cst_55 = arith.constant 1.000000e+00 : f32
    %156 = vector.broadcast %cst_55 : f32 to vector<1x256xf32>
    %157 = arith.addf %13, %156 : vector<1x256xf32>
    %158 = arith.addf %157, %154 : vector<1x256xf32>
    %cst_56 = arith.constant 1.000000e+00 : f32
    %159 = vector.broadcast %cst_56 : f32 to vector<1x256xf32>
    %160 = arith.addf %16, %159 : vector<1x256xf32>
    %161 = arith.addf %160, %155 : vector<1x256xf32>
    %162 = vector.broadcast %158 : vector<1x256xf32> to vector<16x256xf32>
    %163 = vector.broadcast %18 : vector<16x1xf32> to vector<16x256xf32>
    %164 = arith.subf %162, %163 : vector<16x256xf32>
    %165 = math.absf %164 : vector<16x256xf32>
    %cst_57 = arith.constant 1.000000e+00 : f32
    %166 = vector.broadcast %cst_57 : f32 to vector<16x256xf32>
    %167 = arith.subf %166, %165 : vector<16x256xf32>
    %cst_58 = arith.constant 0.000000e+00 : f32
    %168 = vector.broadcast %cst_58 : f32 to vector<16x256xf32>
    %169 = arith.maximumf %167, %168 : vector<16x256xf32>
    %170 = vector.broadcast %161 : vector<1x256xf32> to vector<16x256xf32>
    %171 = vector.broadcast %20 : vector<16x1xf32> to vector<16x256xf32>
    %172 = arith.subf %170, %171 : vector<16x256xf32>
    %173 = math.absf %172 : vector<16x256xf32>
    %cst_59 = arith.constant 1.000000e+00 : f32
    %174 = vector.broadcast %cst_59 : f32 to vector<16x256xf32>
    %175 = arith.subf %174, %173 : vector<16x256xf32>
    %cst_60 = arith.constant 0.000000e+00 : f32
    %176 = vector.broadcast %cst_60 : f32 to vector<16x256xf32>
    %177 = arith.maximumf %175, %176 : vector<16x256xf32>
    %c0_61 = arith.constant 0 : index
    %c4 = arith.constant 4 : index
    %c0_62 = arith.constant 0 : index
    %c0_63 = arith.constant 0 : index
    %178 = vector.load %arg2[%c0_61, %c4, %c0_62, %c0_63] : memref<1x9x48x16xf32, #tpu.memory_space<vmem>>, vector<1x1x48x16xf32>
    %179 = vector.shape_cast %178 : vector<1x1x48x16xf32> to vector<48x16xf32>
    %cst_64 = arith.constant dense<0.000000e+00> : vector<48x256xf32>
    %180 = tpu.matmul %179, %177, %cst_64 {dimension_numbers = #tpu.dot_dimension_numbers<[1], [0], [0], [1], [0, 0, 1, 1], [], []>} : vector<48x16xf32>, vector<16x256xf32>, vector<48x256xf32> -> vector<48x256xf32>
    %181 = vector.shape_cast %180 : vector<48x256xf32> to vector<3x16x256xf32>
    %182 = vector.shape_cast %169 : vector<16x256xf32> to vector<1x16x256xf32>
    %183 = vector.broadcast %182 : vector<1x16x256xf32> to vector<3x16x256xf32>
    %184 = arith.mulf %181, %183 : vector<3x16x256xf32>
    %cst_65 = arith.constant dense<0.000000e+00> : vector<3x256xf32>
    %185 = vector.multi_reduction <add>, %184, %cst_65 [1] : vector<3x16x256xf32> to vector<3x256xf32>
    %186 = arith.addf %153, %185 : vector<3x256xf32>
    %187 = vector.extract_strided_slice %6 {offsets = [5, 0], sizes = [1, 256], strides = [1, 1]} : vector<18x256xf32> to vector<1x256xf32>
    %188 = vector.extract_strided_slice %6 {offsets = [14, 0], sizes = [1, 256], strides = [1, 1]} : vector<18x256xf32> to vector<1x256xf32>
    %cst_66 = arith.constant 1.000000e+00 : f32
    %189 = vector.broadcast %cst_66 : f32 to vector<1x256xf32>
    %190 = arith.addf %13, %189 : vector<1x256xf32>
    %191 = arith.addf %190, %187 : vector<1x256xf32>
    %cst_67 = arith.constant 2.000000e+00 : f32
    %192 = vector.broadcast %cst_67 : f32 to vector<1x256xf32>
    %193 = arith.addf %16, %192 : vector<1x256xf32>
    %194 = arith.addf %193, %188 : vector<1x256xf32>
    %195 = vector.broadcast %191 : vector<1x256xf32> to vector<16x256xf32>
    %196 = vector.broadcast %18 : vector<16x1xf32> to vector<16x256xf32>
    %197 = arith.subf %195, %196 : vector<16x256xf32>
    %198 = math.absf %197 : vector<16x256xf32>
    %cst_68 = arith.constant 1.000000e+00 : f32
    %199 = vector.broadcast %cst_68 : f32 to vector<16x256xf32>
    %200 = arith.subf %199, %198 : vector<16x256xf32>
    %cst_69 = arith.constant 0.000000e+00 : f32
    %201 = vector.broadcast %cst_69 : f32 to vector<16x256xf32>
    %202 = arith.maximumf %200, %201 : vector<16x256xf32>
    %203 = vector.broadcast %194 : vector<1x256xf32> to vector<16x256xf32>
    %204 = vector.broadcast %20 : vector<16x1xf32> to vector<16x256xf32>
    %205 = arith.subf %203, %204 : vector<16x256xf32>
    %206 = math.absf %205 : vector<16x256xf32>
    %cst_70 = arith.constant 1.000000e+00 : f32
    %207 = vector.broadcast %cst_70 : f32 to vector<16x256xf32>
    %208 = arith.subf %207, %206 : vector<16x256xf32>
    %cst_71 = arith.constant 0.000000e+00 : f32
    %209 = vector.broadcast %cst_71 : f32 to vector<16x256xf32>
    %210 = arith.maximumf %208, %209 : vector<16x256xf32>
    %c0_72 = arith.constant 0 : index
    %c5 = arith.constant 5 : index
    %c0_73 = arith.constant 0 : index
    %c0_74 = arith.constant 0 : index
    %211 = vector.load %arg2[%c0_72, %c5, %c0_73, %c0_74] : memref<1x9x48x16xf32, #tpu.memory_space<vmem>>, vector<1x1x48x16xf32>
    %212 = vector.shape_cast %211 : vector<1x1x48x16xf32> to vector<48x16xf32>
    %cst_75 = arith.constant dense<0.000000e+00> : vector<48x256xf32>
    %213 = tpu.matmul %212, %210, %cst_75 {dimension_numbers = #tpu.dot_dimension_numbers<[1], [0], [0], [1], [0, 0, 1, 1], [], []>} : vector<48x16xf32>, vector<16x256xf32>, vector<48x256xf32> -> vector<48x256xf32>
    %214 = vector.shape_cast %213 : vector<48x256xf32> to vector<3x16x256xf32>
    %215 = vector.shape_cast %202 : vector<16x256xf32> to vector<1x16x256xf32>
    %216 = vector.broadcast %215 : vector<1x16x256xf32> to vector<3x16x256xf32>
    %217 = arith.mulf %214, %216 : vector<3x16x256xf32>
    %cst_76 = arith.constant dense<0.000000e+00> : vector<3x256xf32>
    %218 = vector.multi_reduction <add>, %217, %cst_76 [1] : vector<3x16x256xf32> to vector<3x256xf32>
    %219 = arith.addf %186, %218 : vector<3x256xf32>
    %220 = vector.extract_strided_slice %6 {offsets = [6, 0], sizes = [1, 256], strides = [1, 1]} : vector<18x256xf32> to vector<1x256xf32>
    %221 = vector.extract_strided_slice %6 {offsets = [15, 0], sizes = [1, 256], strides = [1, 1]} : vector<18x256xf32> to vector<1x256xf32>
    %cst_77 = arith.constant 2.000000e+00 : f32
    %222 = vector.broadcast %cst_77 : f32 to vector<1x256xf32>
    %223 = arith.addf %13, %222 : vector<1x256xf32>
    %224 = arith.addf %223, %220 : vector<1x256xf32>
    %cst_78 = arith.constant 0.000000e+00 : f32
    %225 = vector.broadcast %cst_78 : f32 to vector<1x256xf32>
    %226 = arith.addf %16, %225 : vector<1x256xf32>
    %227 = arith.addf %226, %221 : vector<1x256xf32>
    %228 = vector.broadcast %224 : vector<1x256xf32> to vector<16x256xf32>
    %229 = vector.broadcast %18 : vector<16x1xf32> to vector<16x256xf32>
    %230 = arith.subf %228, %229 : vector<16x256xf32>
    %231 = math.absf %230 : vector<16x256xf32>
    %cst_79 = arith.constant 1.000000e+00 : f32
    %232 = vector.broadcast %cst_79 : f32 to vector<16x256xf32>
    %233 = arith.subf %232, %231 : vector<16x256xf32>
    %cst_80 = arith.constant 0.000000e+00 : f32
    %234 = vector.broadcast %cst_80 : f32 to vector<16x256xf32>
    %235 = arith.maximumf %233, %234 : vector<16x256xf32>
    %236 = vector.broadcast %227 : vector<1x256xf32> to vector<16x256xf32>
    %237 = vector.broadcast %20 : vector<16x1xf32> to vector<16x256xf32>
    %238 = arith.subf %236, %237 : vector<16x256xf32>
    %239 = math.absf %238 : vector<16x256xf32>
    %cst_81 = arith.constant 1.000000e+00 : f32
    %240 = vector.broadcast %cst_81 : f32 to vector<16x256xf32>
    %241 = arith.subf %240, %239 : vector<16x256xf32>
    %cst_82 = arith.constant 0.000000e+00 : f32
    %242 = vector.broadcast %cst_82 : f32 to vector<16x256xf32>
    %243 = arith.maximumf %241, %242 : vector<16x256xf32>
    %c0_83 = arith.constant 0 : index
    %c6 = arith.constant 6 : index
    %c0_84 = arith.constant 0 : index
    %c0_85 = arith.constant 0 : index
    %244 = vector.load %arg2[%c0_83, %c6, %c0_84, %c0_85] : memref<1x9x48x16xf32, #tpu.memory_space<vmem>>, vector<1x1x48x16xf32>
    %245 = vector.shape_cast %244 : vector<1x1x48x16xf32> to vector<48x16xf32>
    %cst_86 = arith.constant dense<0.000000e+00> : vector<48x256xf32>
    %246 = tpu.matmul %245, %243, %cst_86 {dimension_numbers = #tpu.dot_dimension_numbers<[1], [0], [0], [1], [0, 0, 1, 1], [], []>} : vector<48x16xf32>, vector<16x256xf32>, vector<48x256xf32> -> vector<48x256xf32>
    %247 = vector.shape_cast %246 : vector<48x256xf32> to vector<3x16x256xf32>
    %248 = vector.shape_cast %235 : vector<16x256xf32> to vector<1x16x256xf32>
    %249 = vector.broadcast %248 : vector<1x16x256xf32> to vector<3x16x256xf32>
    %250 = arith.mulf %247, %249 : vector<3x16x256xf32>
    %cst_87 = arith.constant dense<0.000000e+00> : vector<3x256xf32>
    %251 = vector.multi_reduction <add>, %250, %cst_87 [1] : vector<3x16x256xf32> to vector<3x256xf32>
    %252 = arith.addf %219, %251 : vector<3x256xf32>
    %253 = vector.extract_strided_slice %6 {offsets = [7, 0], sizes = [1, 256], strides = [1, 1]} : vector<18x256xf32> to vector<1x256xf32>
    %254 = vector.extract_strided_slice %6 {offsets = [16, 0], sizes = [1, 256], strides = [1, 1]} : vector<18x256xf32> to vector<1x256xf32>
    %cst_88 = arith.constant 2.000000e+00 : f32
    %255 = vector.broadcast %cst_88 : f32 to vector<1x256xf32>
    %256 = arith.addf %13, %255 : vector<1x256xf32>
    %257 = arith.addf %256, %253 : vector<1x256xf32>
    %cst_89 = arith.constant 1.000000e+00 : f32
    %258 = vector.broadcast %cst_89 : f32 to vector<1x256xf32>
    %259 = arith.addf %16, %258 : vector<1x256xf32>
    %260 = arith.addf %259, %254 : vector<1x256xf32>
    %261 = vector.broadcast %257 : vector<1x256xf32> to vector<16x256xf32>
    %262 = vector.broadcast %18 : vector<16x1xf32> to vector<16x256xf32>
    %263 = arith.subf %261, %262 : vector<16x256xf32>
    %264 = math.absf %263 : vector<16x256xf32>
    %cst_90 = arith.constant 1.000000e+00 : f32
    %265 = vector.broadcast %cst_90 : f32 to vector<16x256xf32>
    %266 = arith.subf %265, %264 : vector<16x256xf32>
    %cst_91 = arith.constant 0.000000e+00 : f32
    %267 = vector.broadcast %cst_91 : f32 to vector<16x256xf32>
    %268 = arith.maximumf %266, %267 : vector<16x256xf32>
    %269 = vector.broadcast %260 : vector<1x256xf32> to vector<16x256xf32>
    %270 = vector.broadcast %20 : vector<16x1xf32> to vector<16x256xf32>
    %271 = arith.subf %269, %270 : vector<16x256xf32>
    %272 = math.absf %271 : vector<16x256xf32>
    %cst_92 = arith.constant 1.000000e+00 : f32
    %273 = vector.broadcast %cst_92 : f32 to vector<16x256xf32>
    %274 = arith.subf %273, %272 : vector<16x256xf32>
    %cst_93 = arith.constant 0.000000e+00 : f32
    %275 = vector.broadcast %cst_93 : f32 to vector<16x256xf32>
    %276 = arith.maximumf %274, %275 : vector<16x256xf32>
    %c0_94 = arith.constant 0 : index
    %c7 = arith.constant 7 : index
    %c0_95 = arith.constant 0 : index
    %c0_96 = arith.constant 0 : index
    %277 = vector.load %arg2[%c0_94, %c7, %c0_95, %c0_96] : memref<1x9x48x16xf32, #tpu.memory_space<vmem>>, vector<1x1x48x16xf32>
    %278 = vector.shape_cast %277 : vector<1x1x48x16xf32> to vector<48x16xf32>
    %cst_97 = arith.constant dense<0.000000e+00> : vector<48x256xf32>
    %279 = tpu.matmul %278, %276, %cst_97 {dimension_numbers = #tpu.dot_dimension_numbers<[1], [0], [0], [1], [0, 0, 1, 1], [], []>} : vector<48x16xf32>, vector<16x256xf32>, vector<48x256xf32> -> vector<48x256xf32>
    %280 = vector.shape_cast %279 : vector<48x256xf32> to vector<3x16x256xf32>
    %281 = vector.shape_cast %268 : vector<16x256xf32> to vector<1x16x256xf32>
    %282 = vector.broadcast %281 : vector<1x16x256xf32> to vector<3x16x256xf32>
    %283 = arith.mulf %280, %282 : vector<3x16x256xf32>
    %cst_98 = arith.constant dense<0.000000e+00> : vector<3x256xf32>
    %284 = vector.multi_reduction <add>, %283, %cst_98 [1] : vector<3x16x256xf32> to vector<3x256xf32>
    %285 = arith.addf %252, %284 : vector<3x256xf32>
    %286 = vector.extract_strided_slice %6 {offsets = [8, 0], sizes = [1, 256], strides = [1, 1]} : vector<18x256xf32> to vector<1x256xf32>
    %287 = vector.extract_strided_slice %6 {offsets = [17, 0], sizes = [1, 256], strides = [1, 1]} : vector<18x256xf32> to vector<1x256xf32>
    %cst_99 = arith.constant 2.000000e+00 : f32
    %288 = vector.broadcast %cst_99 : f32 to vector<1x256xf32>
    %289 = arith.addf %13, %288 : vector<1x256xf32>
    %290 = arith.addf %289, %286 : vector<1x256xf32>
    %cst_100 = arith.constant 2.000000e+00 : f32
    %291 = vector.broadcast %cst_100 : f32 to vector<1x256xf32>
    %292 = arith.addf %16, %291 : vector<1x256xf32>
    %293 = arith.addf %292, %287 : vector<1x256xf32>
    %294 = vector.broadcast %290 : vector<1x256xf32> to vector<16x256xf32>
    %295 = vector.broadcast %18 : vector<16x1xf32> to vector<16x256xf32>
    %296 = arith.subf %294, %295 : vector<16x256xf32>
    %297 = math.absf %296 : vector<16x256xf32>
    %cst_101 = arith.constant 1.000000e+00 : f32
    %298 = vector.broadcast %cst_101 : f32 to vector<16x256xf32>
    %299 = arith.subf %298, %297 : vector<16x256xf32>
    %cst_102 = arith.constant 0.000000e+00 : f32
    %300 = vector.broadcast %cst_102 : f32 to vector<16x256xf32>
    %301 = arith.maximumf %299, %300 : vector<16x256xf32>
    %302 = vector.broadcast %293 : vector<1x256xf32> to vector<16x256xf32>
    %303 = vector.broadcast %20 : vector<16x1xf32> to vector<16x256xf32>
    %304 = arith.subf %302, %303 : vector<16x256xf32>
    %305 = math.absf %304 : vector<16x256xf32>
    %cst_103 = arith.constant 1.000000e+00 : f32
    %306 = vector.broadcast %cst_103 : f32 to vector<16x256xf32>
    %307 = arith.subf %306, %305 : vector<16x256xf32>
    %cst_104 = arith.constant 0.000000e+00 : f32
    %308 = vector.broadcast %cst_104 : f32 to vector<16x256xf32>
    %309 = arith.maximumf %307, %308 : vector<16x256xf32>
    %c0_105 = arith.constant 0 : index
    %c8 = arith.constant 8 : index
    %c0_106 = arith.constant 0 : index
    %c0_107 = arith.constant 0 : index
    %310 = vector.load %arg2[%c0_105, %c8, %c0_106, %c0_107] : memref<1x9x48x16xf32, #tpu.memory_space<vmem>>, vector<1x1x48x16xf32>
    %311 = vector.shape_cast %310 : vector<1x1x48x16xf32> to vector<48x16xf32>
    %cst_108 = arith.constant dense<0.000000e+00> : vector<48x256xf32>
    %312 = tpu.matmul %311, %309, %cst_108 {dimension_numbers = #tpu.dot_dimension_numbers<[1], [0], [0], [1], [0, 0, 1, 1], [], []>} : vector<48x16xf32>, vector<16x256xf32>, vector<48x256xf32> -> vector<48x256xf32>
    %313 = vector.shape_cast %312 : vector<48x256xf32> to vector<3x16x256xf32>
    %314 = vector.shape_cast %301 : vector<16x256xf32> to vector<1x16x256xf32>
    %315 = vector.broadcast %314 : vector<1x16x256xf32> to vector<3x16x256xf32>
    %316 = arith.mulf %313, %315 : vector<3x16x256xf32>
    %cst_109 = arith.constant dense<0.000000e+00> : vector<3x256xf32>
    %317 = vector.multi_reduction <add>, %316, %cst_109 [1] : vector<3x16x256xf32> to vector<3x256xf32>
    %318 = arith.addf %285, %317 : vector<3x256xf32>
    %c0_110 = arith.constant 0 : index
    %c0_111 = arith.constant 0 : index
    %319 = vector.load %arg5[%c0_110, %c0_111] : memref<3x1xf32, #tpu.memory_space<vmem>>, vector<3x1xf32>
    %320 = vector.broadcast %319 : vector<3x1xf32> to vector<3x256xf32>
    %321 = arith.addf %318, %320 : vector<3x256xf32>
    %c0_112 = arith.constant 0 : index
    %c0_113 = arith.constant 0 : index
    %c0_114 = arith.constant 0 : index
    %322 = vector.load %arg6[%c0_112, %c0_113, %c0_114] : memref<1x3x256xf32, #tpu.memory_space<vmem>>, vector<1x3x256xf32>
    %323 = vector.shape_cast %322 : vector<1x3x256xf32> to vector<3x256xf32>
    %324 = vector.shape_cast %321 : vector<3x256xf32> to vector<1x3x256xf32>
    tpu.vector_store %arg6[%c0_112, %c0_113, %c0_114], %324 {strides = array<i32>} : memref<1x3x256xf32, #tpu.memory_space<vmem>>, vector<1x3x256xf32>,
    return
  }
  func.func @transform_0(%arg0: i32) -> (i32, i32, i32) {
    %c0_i32 = arith.constant 0 : i32
    %c0_i32_0 = arith.constant 0 : i32
    %c0_i32_1 = arith.constant 0 : i32
    return %arg0, %c0_i32, %c0_i32_0 : i32, i32, i32
  }
  func.func @transform_1(%arg0: i32) -> (i32, i32, i32, i32) {
    %c0_i32 = arith.constant 0 : i32
    %c0_i32_0 = arith.constant 0 : i32
    %c0_i32_1 = arith.constant 0 : i32
    %c0_i32_2 = arith.constant 0 : i32
    return %arg0, %c0_i32, %c0_i32_0, %c0_i32_1 : i32, i32, i32, i32
  }
  func.func @transform_2(%arg0: i32) -> (i32, i32) {
    %c0_i32 = arith.constant 0 : i32
    %c0_i32_0 = arith.constant 0 : i32
    %c0_i32_1 = arith.constant 0 : i32
    return %c0_i32, %c0_i32_0 : i32, i32
  }
  func.func @transform_3(%arg0: i32) -> (i32, i32) {
    %c0_i32 = arith.constant 0 : i32
    %c0_i32_0 = arith.constant 0 : i32
    %c0_i32_1 = arith.constant 0 : i32
    return %c0_i32, %c0_i32_0 : i32, i32
  }
  func.func @transform_4(%arg0: i32) -> (i32, i32) {
    %c0_i32 = arith.constant 0 : i32
    %c0_i32_0 = arith.constant 0 : i32
    %c0_i32_1 = arith.constant 0 : i32
    return %c0_i32, %c0_i32_0 : i32, i32
  }
  func.func @transform_5(%arg0: i32) -> (i32, i32, i32) {
    %c0_i32 = arith.constant 0 : i32
    %c0_i32_0 = arith.constant 0 : i32
    %c0_i32_1 = arith.constant 0 : i32
    return %arg0, %c0_i32, %c0_i32_0 : i32, i32, i32
  }
}

</mosaic_0001>

<bundles_post_ra>
// kernel: tpu_custom_call.1
= control target key start
LH: loop header
LB: loop body
LE: loop exit
PB: predicated region body
PF: predicated region fallthrough
CT: control target
= control target key end

     0   :  { %s2858_s18 = smov 0   ;;  %s3786_s0 = inlined_call_operand.vmem [shape: f32[2,27,256], index: 0, kind: input, shape index: {}]   ;;  %s3787_s1 = inlined_call_operand.vmem [shape: f32[2,9,48,16], index: 1, kind: input, shape index: {}]   ;;  %s3788_s2 = inlined_call_operand.vmem [shape: f32[18,27], index: 2, kind: input, shape index: {}]   ;;  %s3789_s3 = inlined_call_operand.vmem [shape: f32[18,1], index: 3, kind: input, shape index: {}]   ;;  %s3790_s4 = inlined_call_operand.vmem [shape: f32[3,1], index: 4, kind: input, shape index: {}]   ;;  %s3791_s5 = inlined_call_operand.vmem [shape: f32[2,3,256], index: 5, kind: output, shape index: {}]  }
   0x1 LB: > { %s2634_s19 = sadd.s32 4294967295, %s2823_s18   ;;  %p2638_p0 = scmp.ge.s32.totalorder %s2823_s18, 1  ;;  %s2823_s18 = sphi %s2858_s18, %s15_s18  }
   0x2   : > { %p197_p1 = scmp.lt.s32.totalorder %s2823_s18, 3 }
   0x4   : > { %p198_p2 = pnand %p2638_p0, %p197_p1 }
   0x6   : > { %201 = sbr.rel (%p198_p2) target bundleno = 637 (0x27d), region = 40 }
   0xd   : > { %p230_p3 = scmp.lt.s32.totalorder %s2634_s19, 1  ;;  %v2825_v0 = vmov 0.0   ;;  %v2826_v1 = vmov 0   ;;  %v256_v2 = vld [vmem:[%s3789_s3] sm:$0xff]  ;;  %v257_v3 = vld [vmem:[%s3789_s3 + $0x8] sm:$0xff]  ;;  %vm284_vm0 = vcmask 1042432   ;;  %v374_v20 = vlaneseq }
   0xe   : > { %355 = vmatprep.mubr.f32.mxu0 %v2825_v0  ;;  %545 = vmatprep.mubr.f32.mxu1 %v2825_v0  ;;  %v258_v4 = vld [vmem:[%s3789_s3 + $0x10] sm:$0x3]  ;;  %vm2827_vm1 = vmmov 1   ;;  %v253_v17 = vld [vmem:[%s3788_s2] sm:$0xff]  ;;  %vm274_vm3 = vcmask 220160   ;;  %v254_v18 = vld [vmem:[%s3788_s2 + $0x8] sm:$0xff] }
   0xf   : > { %s3817_s19 = smov (!%p230_p3, %s2634_s19), 1  ;;  %2816 = vset.pattern.permute.xlu1 %v2826_v1  ;;  %2815 = vset.pattern.permute.xlu0 %v2826_v1  ;;  %vm2760_vm2 = vmpackc.low %vm284_vm0, %vm2827_vm1  ;;  %v255_v19 = vld [vmem:[%s3788_s2 + $0x10] sm:$0x3]  ;;  %v375_v21 = vand.u32 127, %v374_v20  ;;  %v2899_v31 = vshrl.u32 %v374_v20, 7  ;;  %vm456_vm4 = vcmask 130048  }
  0x10   : > { %261 = vperm.xlu1 %2816, %v256_v2   ;;  %266 = vperm.xlu0 %2815, %v257_v3   ;;  %s2753_s24 = sshll.u32 %s3817_s19, 6  ;;  %s2803_s11 = smul.u32 432, %s3817_s19  ;;  %vm2556_vm5 = vcmask 1041409   ;;  %vm2558_vm6 = vcmask 1045509   ;;  %vm2561_vm7 = vcmask 1042434   ;;  %vm2563_vm8 = vcmask 1046534  }
  0x11   : > { %s234_s29 = scalar_lea.vmem %s3786_s0, %s2753_s24  ;;  %v376_v22 = vadd.s32 128, %v375_v21  ;;  %v377_v23 = vcvt.s32.f32 %v375_v21  ;;  %v2911_v38 = vsub.s32 6, %v2899_v31  ;;  %v2914_v39 = vsub.s32 7, %v2899_v31  ;;  %s2754_s17 = sshll.u32 %s3817_s19, 3 }
  0x12   : > { %v246_v5 = vld [vmem:[%s234_s29 + $0x8] sm:$0xff]  ;;  %v248_v6 = vld [vmem:[%s234_s29 + $0x18] sm:$0xff]  ;;  %v245_v7 = vld [vmem:[%s234_s29] sm:$0xff]  ;;  %v391_v63 = vadd.s32 8, %v2899_v31  ;;  %s3034_s16 = scalar_lea.vmem %s3787_s1, %s2803_s11  ;;  %s244_s22 = scalar_lea.vmem %s3791_s5, %s2754_s17 }
  0x13   : > { %v2755_v8 = vpack.c.bf16 %v248_v6, %v246_v5  ;;  %v247_v9 = vld [vmem:[%s234_s29 + $0x10] sm:$0xff]  ;;  %v250_v10 = vld [vmem:[%s234_s29 + $0x28] sm:$0xff]  ;;  %v252_v11 = vld [vmem:[%s234_s29 + $0x38] sm:$0x7]  ;;  %v378_v24 = vcvt.s32.f32 %v376_v22  ;;  %v379_v25 = vadd.f32 0.5, %v377_v23  ;;  %v2955_v5 = vsub.s32 1, %v2899_v31 }
  0x14   : > { %271 = vperm.xlu0 %2815, %v258_v4   ;;  %v2757_v12 = vpack.c.bf16 %v247_v9, %v245_v7  ;;  %v2759_v13 = vpack.c.bf16 %v252_v11, %v250_v10  ;;  %v249_v14 = vld [vmem:[%s234_s29 + $0x20] sm:$0xff]  ;;  %v251_v15 = vld [vmem:[%s234_s29 + $0x30] sm:$0x7]  ;;  %v2959_v7 = vsub.s32 2, %v2899_v31  ;;  %v2964_v10 = vcvt.s32.f32 %v2899_v31 }
  0x15   : > { %2756 = vmatprep.subr.bf16.mxu0 %v2755_v8  ;;  %v2762_v16 = vpack.c.bf16 %v251_v15, %v249_v14  ;;  %v380_v26 = vadd.f32 0.5, %v378_v24  ;;  %v381_v27 = vmul.f32 0.071428575, %v379_v25  ;;  %v2966_v11 = vcvt.s32.f32 %v391_v63 }
  0x16   : > { %2758 = vmatpush1.bf16.msra.mxu0 %v2757_v12  ;;  %v2969_v12 = vsub.s32 3, %v2899_v31 }
  0x17   : > { %2761 = vmatprep.subr.msk.bf16.mxu0 %vm2760_vm2, %v2759_v13  ;;  %v382_v28 = vmul.f32 0.071428575, %v380_v26  ;;  %v2895_v29 = vfloor.f32 %v381_v27  ;;  %v2999_v26 = vsub.s32 4, %v2899_v31 }
  0x19   : > { %v2897_v30 = vfloor.f32 %v382_v28  ;;  %v2902_v33 = vadd.f32 2.0, %v2895_v29  ;;  %v385_v34 = vmul.f32 14.0, %v2895_v29 }
  0x1a   : > { %2764 = vmatpush1.bf16.msk.msra.mxu0 %vm2760_vm2, %v2762_v16 }
  0x1b   : > { %v2906_v36 = vadd.f32 2.0, %v2897_v30  ;;  %v386_v41 = vmul.f32 14.0, %v2897_v30  ;;  %v387_v45 = vsub.f32 %v377_v23, %v385_v34 }
  0x1d   : > { %2646 = vmatmul.mubr.msk.f32.vlgmr.msra.gmra.mrb[0].mxu0 %vm274_vm3, %v253_v17  ;;  %v388_v51 = vsub.f32 %v378_v24, %v386_v41  ;;  %v2939_v56 = vadd.f32 1.0, %v387_v45  ;;  %v874_v59 = vadd.f32 2.0, %v387_v45 }
  0x1e   : > { %361 = vmatprep.mubr.f32.mxu0 %v2825_v0 }
  0x1f   : > { %v637_v62 = vadd.f32 1.0, %v388_v51  ;;  %v2952_v4 = vadd.f32 2.0, %v388_v51 }
  0x21   : > { %2647 = vmatmul.mubr.msk.f32.gmra.mrb[2].mxu0 %vm274_vm3, %v254_v18 }
  0x22   : > { %367 = vmatprep.mubr.f32.mxu0 %v2825_v0 }
  0x25   : > { %2648 = vmatmul.mubr.msk.f32.gmra.mrb[4].mxu0 %vm274_vm3, %v255_v19  ;;  %v2985_v19 = vsub.s32 5, %v2899_v31 }
  0x26   : > { %539 = vmatprep.mubr.f32.mxu0 %v2825_v0 }
  0x8f   : > { %v262_v32 = vpop.permute.xlu1 %261  ;;  %v267_v42 = vpop.permute.xlu0 %266 }
  0x93   : > { %v272_v57 = vpop.permute.xlu0 %271 }
  0xf0   : > { %v357_v35 = vpop.f32.mrb[0].mxu0 }
  0xf1   : > { %v2908_v37 = vadd.f32 %v357_v35, %v262_v32  ;;  %v359_v40 = vpop.f32.mrb[1].mxu0 }
  0xf2   : > { %v2917_v43 = vadd.f32 %v359_v40, %v262_v32 }
  0xf3   : > { %v1820_v44 = vadd.f32 %v2902_v33, %v2908_v37 }
  0xf4   : > { %v1821_v46 = vadd.f32 %v2906_v36, %v2917_v43  ;;  %v363_v47 = vpop.f32.mrb[2].mxu0 }
  0xf5   : > { %v2924_v48 = vrot.slane %v1820_v44, %v2911_v38  ;;  %v2927_v49 = vrot.slane %v1820_v44, %v2914_v39  ;;  %v365_v50 = vpop.f32.mrb[3].mxu0  ;;  %v2937_v55 = vadd.f32 %v363_v47, %v267_v42 }
  0xf6   : > { %v2930_v52 = vrot.slane %v1821_v46, %v2911_v38  ;;  %v2933_v53 = vrot.slane %v1821_v46, %v2914_v39  ;;  %v2935_v54 = vadd.f32 %v365_v50, %v267_v42 }
  0xf7   : > { %v2948_v2 = vadd.f32 %v387_v45, %v2937_v55  ;;  %v638_v3 = vadd.f32 %v2939_v56, %v2937_v55  ;;  %v876_v6 = vadd.f32 %v874_v59, %v2937_v55 }
  0xf8   : > { %v369_v58 = vpop.f32.mrb[4].mxu0  ;;  %v2945_v1 = vadd.f32 %v388_v51, %v2935_v54  ;;  %v639_v9 = vadd.f32 %v637_v62, %v2935_v54  ;;  %v877_v16 = vadd.f32 %v2952_v4, %v2935_v54 }
  0xf9   : > { %v2941_v60 = vadd.f32 %v369_v58, %v272_v57  ;;  %v371_v61 = vpop.f32.mrb[5].mxu0  ;;  %v667_v14 = vrot.slane %v638_v3, %v2959_v7  ;;  %v429_v17 = vrot.slane %v2948_v2, %v2955_v5  ;;  %v2982_v18 = vrot.slane %v876_v6, %v2969_v12 }
  0xfa   : > { %v433_v13 = vrot.slane %v2945_v1, %v2955_v5  ;;  %v671_v22 = vrot.slane %v639_v9, %v2959_v7  ;;  %v2991_v23 = vrot.slane %v638_v3, %v2985_v19  ;;  %v2994_v24 = vrot.slane %v876_v6, %v2911_v38  ;;  %v2530_v6 = vld [vmem:[%s3790_s4] sm:$0x7] }
  0xfb   : > { %v2294_v8 = vadd.f32 %v874_v59, %v2941_v60  ;;  %v2996_v25 = vadd.f32 %v371_v61, %v272_v57  ;;  %v672_v27 = vsub.f32 %v667_v14, %v2964_v10  ;;  %v674_v28 = vsub.f32 %v667_v14, %v2966_v11  ;;  %2533 = vperm.xlu1 %2816, %v2530_v6   ;;  %v450_v6 = vld [vmem:[%s3034_s16] sm:$0xff] }
  0xfc   : > { %v435_v20 = vsub.f32 %v433_v13, %v2964_v10  ;;  %v437_v21 = vsub.f32 %v433_v13, %v2966_v11  ;;  %v909_v32 = vrot.slane %v877_v16, %v2969_v12  ;;  %v434_v34 = vsub.f32 %v429_v17, %v2964_v10 }
  0xfd   : > { %v2975_v15 = vrot.slane %v2294_v8, %v2955_v5  ;;  %v910_v35 = vsub.f32 %v2982_v18, %v2964_v10  ;;  %v436_v42 = vsub.f32 %v429_v17, %v2966_v11  ;;  %v912_v44 = vsub.f32 %v2982_v18, %v2966_v11 }
  0xfe   : > { %v439_v40 = vand.u32 2147483647, %v435_v20  ;;  %v441_v41 = vand.u32 2147483647, %v437_v21  ;;  %v438_v45 = vand.u32 2147483647, %v434_v34  ;;  %v673_v46 = vsub.f32 %v671_v22, %v2964_v10 }
  0xff   : > { %v675_v47 = vsub.f32 %v671_v22, %v2966_v11  ;;  %v1382_v50 = vsub.f32 %v2991_v23, %v2964_v10  ;;  %v440_v58 = vand.u32 2147483647, %v436_v42  ;;  %v1384_v59 = vsub.f32 %v2991_v23, %v2966_v11  ;;  %v454_v23 = vld [vmem:[%s3034_s16 + $0x20] sm:$0xff] }
 0x100   : > { %v443_v51 = vsub.f32 1.0, %v439_v40  ;;  %v445_v57 = vsub.f32 1.0, %v441_v41  ;;  %v3018_v61 = vrot.slane %v639_v9, %v2985_v19  ;;  %v3021_v63 = vrot.slane %v877_v16, %v2911_v38 }
 0x101   : > { %v442_v3 = vsub.f32 1.0, %v438_v45  ;;  %v3027_v8 = vadd.f32 %v637_v62, %v2996_v25  ;;  %v444_v17 = vsub.f32 1.0, %v440_v58  ;;  %v677_v20 = vand.u32 2147483647, %v673_v46 }
 0x102   : > { %v447_v13 = vmax.f32 %v443_v51, 0.0  ;;  %v449_v14 = vmax.f32 %v445_v57, 0.0  ;;  %v679_v21 = vand.u32 2147483647, %v675_v47  ;;  %v911_v9 = vsub.f32 %v909_v32, %v2964_v10 }
 0x103   : > { %v446_v18 = vmax.f32 %v442_v3, 0.0  ;;  %v448_v38 = vmax.f32 %v444_v17, 0.0  ;;  %v913_v16 = vsub.f32 %v909_v32, %v2966_v11  ;;  %v676_v34 = vand.u32 2147483647, %v672_v27 }
 0x104   : > { %v2765_v22 = vpack.c.bf16 %v449_v14, %v447_v13  ;;  %v681_v62 = vsub.f32 1.0, %v677_v20  ;;  %v683_v40 = vsub.f32 1.0, %v679_v21  ;;  %v915_v41 = vand.u32 2147483647, %v911_v9  ;;  %v451_v21 = vld [vmem:[%s3034_s16 + $0x8] sm:$0xff] }
 0x105   : > { %v678_v42 = vand.u32 2147483647, %v674_v28  ;;  %v2767_v45 = vpack.c.bf16 %v448_v38, %v446_v18  ;;  %v917_v46 = vand.u32 2147483647, %v913_v16  ;;  %v680_v47 = vsub.f32 1.0, %v676_v34 }
 0x106   : > { %2766 = vmatprep.subr.bf16.mxu0 %v2765_v22  ;;  %2801 = vmatprep.subr.bf16.mxu1 %v2765_v22  ;;  %v914_v51 = vand.u32 2147483647, %v910_v35  ;;  %v685_v57 = vmax.f32 %v681_v62, 0.0  ;;  %v687_v32 = vmax.f32 %v683_v40, 0.0  ;;  %v919_v27 = vsub.f32 1.0, %v915_v41 }
 0x107   : > { %v682_v58 = vsub.f32 1.0, %v678_v42  ;;  %2768 = vmatpush1.bf16.msra.mxu0 %v2767_v45  ;;  %2802 = vmatpush1.bf16.msra.mxu1 %v2767_v45  ;;  %v921_v3 = vsub.f32 1.0, %v917_v46  ;;  %v684_v13 = vmax.f32 %v680_v47, 0.0  ;;  %v916_v14 = vand.u32 2147483647, %v912_v44 }
 0x108   : > { %v918_v17 = vsub.f32 1.0, %v914_v51  ;;  %v2769_v20 = vpack.c.bf16 %v687_v32, %v685_v57  ;;  %v923_v28 = vmax.f32 %v919_v27, 0.0  ;;  %v1147_v18 = vrot.slane %v2945_v1, %v2999_v26  ;;  %v2655_v51 = vld [vmem:[%s3034_s16 + $0x30] sm:$0xff] }
 0x109   : > { %v686_v9 = vmax.f32 %v682_v58, 0.0  ;;  %v925_v22 = vmax.f32 %v921_v3, 0.0  ;;  %v920_v35 = vsub.f32 1.0, %v916_v14  ;;  %v1383_v16 = vsub.f32 %v3018_v61, %v2964_v10  ;;  %v452_v3 = vld [vmem:[%s3034_s16 + $0x10] sm:$0xff] }
 0x10a   : > { %v922_v38 = vmax.f32 %v918_v17, 0.0  ;;  %v3043_v34 = vsub.s32 0, %v2899_v31  ;;  %2770 = vmatprep.subr.bf16.mxu0 %v2769_v20  ;;  %2649 = vmatmul.mubr.msk.f32.vlgmr.msra.gmra.mrb[6].mxu0 %vm456_vm4, %v450_v6  ;;  %v1149_v62 = vsub.f32 %v1147_v18, %v2964_v10  ;;  %v1151_v40 = vsub.f32 %v1147_v18, %v2966_v11 }
 0x10b   : > { %v2771_v44 = vpack.c.bf16 %v686_v9, %v684_v13  ;;  %v2773_v41 = vpack.c.bf16 %v925_v22, %v923_v28  ;;  %2650 = vmatmul.mubr.msk.f32.vlgmr.msra.gmra.mrb[0].mxu1 %vm456_vm4, %v451_v21  ;;  %v924_v42 = vmax.f32 %v920_v35, 0.0  ;;  %v1385_v45 = vsub.f32 %v3018_v61, %v2966_v11  ;;  %777 = vmatprep.mubr.f32.mxu0 %v2825_v0  ;;  %v2656_v28 = vld [vmem:[%s3034_s16 + $0x38] sm:$0xff] }
 0x10c   : > { %v1387_v46 = vand.u32 2147483647, %v1383_v16  ;;  %v1153_v31 = vand.u32 2147483647, %v1149_v62  ;;  %v1155_v47 = vand.u32 2147483647, %v1151_v40  ;;  %551 = vmatprep.mubr.f32.mxu1 %v2825_v0  ;;  %v1143_v57 = vrot.slane %v2948_v2, %v2999_v26 }
 0x10d   : > { %2772 = vmatpush1.bf16.msra.mxu0 %v2771_v44  ;;  %v1617_v32 = vsub.f32 %v3021_v63, %v2964_v10  ;;  %2774 = vmatprep.subr.bf16.mxu1 %v2773_v41  ;;  %v2775_v27 = vpack.c.bf16 %v924_v42, %v922_v38  ;;  %v1389_v58 = vand.u32 2147483647, %v1385_v45  ;;  %v1619_v6 = vsub.f32 %v3021_v63, %v2966_v11  ;;  %v453_v42 = vld [vmem:[%s3034_s16 + $0x18] sm:$0xff] }
 0x10e   : > { %v1391_v61 = vsub.f32 1.0, %v1387_v46  ;;  %v1157_v13 = vsub.f32 1.0, %v1153_v31  ;;  %v1159_v14 = vsub.f32 1.0, %v1155_v47  ;;  %v1148_v17 = vsub.f32 %v1143_v57, %v2964_v10 }
 0x10f   : > { %v1150_v20 = vsub.f32 %v1143_v57, %v2966_v11  ;;  %2776 = vmatpush1.bf16.msra.mxu1 %v2775_v27  ;;  %v1393_v21 = vsub.f32 1.0, %v1389_v58  ;;  %v1621_v18 = vand.u32 2147483647, %v1617_v32  ;;  %v1623_v22 = vand.u32 2147483647, %v1619_v6 }
 0x110   : > { %v1395_v9 = vmax.f32 %v1391_v61, 0.0  ;;  %2661 = vmatmul.mubr.msk.f32.vlgmr.msra.gmra.mrb[8].mxu0 %vm456_vm4, %v2655_v51  ;;  %v1161_v35 = vmax.f32 %v1157_v13, 0.0  ;;  %v1163_v38 = vmax.f32 %v1159_v14, 0.0  ;;  %2651 = vmatmul.mubr.msk.f32.gmra.mrb[2].mxu1 %vm456_vm4, %v452_v3  ;;  %v1152_v63 = vand.u32 2147483647, %v1148_v17  ;;  %v2657_v61 = vld [vmem:[%s3034_s16 + $0x40] sm:$0xff] }
 0x111   : > { %v1154_v16 = vand.u32 2147483647, %v1150_v20  ;;  %783 = vmatprep.mubr.f32.mxu0 %v2825_v0  ;;  %v2089_v44 = vrot.slane %v3027_v8, %v3043_v34  ;;  %v1397_v62 = vmax.f32 %v1393_v21, 0.0  ;;  %v1625_v40 = vsub.f32 1.0, %v1621_v18  ;;  %557 = vmatprep.mubr.f32.mxu1 %v2825_v0  ;;  %v2658_v21 = vld [vmem:[%s3034_s16 + $0x48] sm:$0xff] }
 0x112   : > { %v1627_v41 = vsub.f32 1.0, %v1623_v22  ;;  %v2777_v45 = vpack.c.bf16 %v1163_v38, %v1161_v35  ;;  %v1156_v46 = vsub.f32 1.0, %v1152_v63  ;;  %v1386_v47 = vand.u32 2147483647, %v1382_v50  ;;  %v455_v22 = vld [vmem:[%s3034_s16 + $0x28] sm:$0xff] }
 0x113   : > { %v1158_v31 = vsub.f32 1.0, %v1154_v16  ;;  %v2781_v51 = vpack.c.bf16 %v1397_v62, %v1395_v9  ;;  %v1629_v57 = vmax.f32 %v1625_v40, 0.0  ;;  %v1388_v8 = vand.u32 2147483647, %v1384_v59 }
 0x114   : > { %v1631_v32 = vmax.f32 %v1627_v41, 0.0  ;;  %2662 = vmatmul.mubr.msk.f32.gmra.mrb[10].mxu0 %vm456_vm4, %v2656_v28  ;;  %2778 = vmatprep.subr.bf16.mxu0 %v2777_v45  ;;  %v1160_v27 = vmax.f32 %v1156_v46, 0.0  ;;  %v1853_v3 = vrot.slane %v2945_v1, %v2914_v39  ;;  %v1616_v50 = vsub.f32 %v2994_v24, %v2964_v10  ;;  %v2659_v45 = vld [vmem:[%s3034_s16 + $0x50] sm:$0xff] }
 0x115   : > { %v1162_v58 = vmax.f32 %v1158_v31, 0.0  ;;  %2652 = vmatmul.mubr.msk.f32.gmra.mrb[4].mxu1 %vm456_vm4, %v453_v42  ;;  %v1618_v6 = vsub.f32 %v2994_v24, %v2966_v11  ;;  %2782 = vmatprep.subr.bf16.mxu1 %v2781_v51  ;;  %v2091_v59 = vsub.f32 %v2089_v44, %v2964_v10  ;;  %v2093_v17 = vsub.f32 %v2089_v44, %v2966_v11  ;;  %v2667_v51 = vld [vmem:[%s3034_s16 + $0x60] sm:$0xff] }
 0x116   : > { %563 = vmatprep.mubr.f32.mxu1 %v2825_v0  ;;  %789 = vmatprep.mubr.f32.mxu0 %v2825_v0  ;;  %v1855_v14 = vsub.f32 %v1853_v3, %v2964_v10  ;;  %v1857_v1 = vsub.f32 %v1853_v3, %v2966_v11  ;;  %v2785_v20 = vpack.c.bf16 %v1631_v32, %v1629_v57  ;;  %v1390_v24 = vsub.f32 1.0, %v1386_v47 }
 0x117   : > { %v2779_v13 = vpack.c.bf16 %v1162_v58, %v1160_v27  ;;  %v1392_v28 = vsub.f32 1.0, %v1388_v8  ;;  %v1620_v63 = vand.u32 2147483647, %v1616_v50  ;;  %v1622_v16 = vand.u32 2147483647, %v1618_v6 }
 0x118   : > { %2663 = vmatmul.mubr.msk.f32.gmra.mrb[12].mxu0 %vm456_vm4, %v2657_v61  ;;  %v1859_v9 = vand.u32 2147483647, %v1855_v14  ;;  %v1861_v18 = vand.u32 2147483647, %v1857_v1  ;;  %v1394_v44 = vmax.f32 %v1390_v24, 0.0  ;;  %v3102_v42 = vadd.f32 %v2895_v29, %v2908_v37 }
 0x119   : > { %2780 = vmatpush1.bf16.msra.mxu0 %v2779_v13  ;;  %2653 = vmatmul.mubr.msk.f32.gmra.mrb[6].mxu1 %vm456_vm4, %v454_v23  ;;  %v1396_v62 = vmax.f32 %v1392_v28, 0.0  ;;  %v2095_v40 = vand.u32 2147483647, %v2091_v59  ;;  %v2097_v41 = vand.u32 2147483647, %v2093_v17  ;;  %v2295_v47 = vadd.f32 %v2952_v4, %v2996_v25  ;;  %v2660_v25 = vld [vmem:[%s3034_s16 + $0x58] sm:$0xff] }
 0x11a   : > { %2786 = vmatprep.subr.bf16.mxu0 %v2785_v20  ;;  %569 = vmatprep.mubr.f32.mxu1 %v2825_v0  ;;  %v1863_v35 = vsub.f32 1.0, %v1859_v9  ;;  %v1865_v38 = vsub.f32 1.0, %v1861_v18  ;;  %v3113_v57 = vadd.f32 %v2897_v30, %v2917_v43  ;;  %v1624_v32 = vsub.f32 1.0, %v1620_v63  ;;  %v2679_v28 = vld [vmem:[%s3034_s16 + $0x90] sm:$0xff]  ;;  %v2670_v63 = vld [vmem:[%s3034_s16 + $0x78] sm:$0xff] }
 0x11b   : > { %795 = vmatprep.mubr.f32.mxu0 %v2825_v0  ;;  %v1626_v8 = vsub.f32 1.0, %v1622_v16  ;;  %v2783_v27 = vpack.c.bf16 %v1396_v62, %v1394_v44  ;;  %v2099_v58 = vsub.f32 1.0, %v2095_v40  ;;  %v2101_v61 = vsub.f32 1.0, %v2097_v41  ;;  %v2681_v62 = vld [vmem:[%s3034_s16 + $0xa0] sm:$0xff] }
 0x11c   : > { %2664 = vmatmul.mubr.msk.f32.gmra.mrb[14].mxu0 %vm456_vm4, %v2658_v21  ;;  %v1867_v46 = vmax.f32 %v1863_v35, 0.0  ;;  %v1869_v31 = vmax.f32 %v1865_v38, 0.0  ;;  %v1112_v3 = vadd.f32 1.0, %v2895_v29  ;;  %v1113_v50 = vadd.f32 1.0, %v2897_v30  ;;  %v2668_v29 = vld [vmem:[%s3034_s16 + $0x68] sm:$0xff]  ;;  %v2671_v41 = vld [vmem:[%s3034_s16 + $0x80] sm:$0xff] }
 0x11d   : > { %2654 = vmatmul.mubr.msk.f32.gmra.mrb[8].mxu1 %vm456_vm4, %v455_v22  ;;  %801 = vmatprep.mubr.f32.mxu0 %v2825_v0  ;;  %v3123_v6 = vrot.slane %v3102_v42, %v2955_v5  ;;  %v2327_v23 = vrot.slane %v2295_v47, %v2955_v5  ;;  %v1628_v30 = vmax.f32 %v1624_v32, 0.0  ;;  %v1630_v59 = vmax.f32 %v1626_v8, 0.0 }
 0x11e   : > { %1015 = vmatprep.mubr.f32.mxu1 %v2825_v0  ;;  %v2789_v4 = vpack.c.bf16 %v1869_v31, %v1867_v46  ;;  %v1849_v13 = vrot.slane %v2948_v2, %v2914_v39  ;;  %v3132_v14 = vrot.slane %v3113_v57, %v2955_v5  ;;  %v2103_v1 = vmax.f32 %v2099_v58, 0.0  ;;  %v2669_v39 = vld [vmem:[%s3034_s16 + $0x70] sm:$0xff] }
 0x11f   : > { %v2105_v17 = vmax.f32 %v2101_v61, 0.0  ;;  %v1114_v20 = vadd.f32 %v1112_v3, %v2908_v37  ;;  %v1115_v24 = vadd.f32 %v1113_v50, %v2917_v43  ;;  %v2056_v2 = vadd.f32 %v2939_v56, %v2941_v60  ;;  %v2680_v60 = vld [vmem:[%s3034_s16 + $0x98] sm:$0xff] }
 0x120   : > { %2665 = vmatmul.mubr.msk.f32.gmra.mrb[16].mxu0 %vm456_vm4, %v2659_v45  ;;  %v2329_v5 = vsub.f32 %v2327_v23, %v2964_v10  ;;  %v2787_v21 = vpack.c.bf16 %v1630_v59, %v1628_v30  ;;  %v1854_v37 = vsub.f32 %v1849_v13, %v2964_v10  ;;  %v1856_v9 = vsub.f32 %v1849_v13, %v2966_v11  ;;  %v2691_v13 = vld [vmem:[%s3034_s16 + $0xc0] sm:$0xff] }
 0x121   : > { %2673 = vmatmul.mubr.msk.f32.vlgmr.msra.gmra.mrb[10].mxu1 %vm456_vm4, %v2667_v51  ;;  %807 = vmatprep.mubr.f32.mxu0 %v2825_v0  ;;  %v2793_v43 = vpack.c.bf16 %v2105_v17, %v2103_v1  ;;  %v3150_v18 = vrot.slane %v3102_v42, %v2959_v7  ;;  %v3154_v22 = vrot.slane %v3113_v57, %v2959_v7  ;;  %v2682_v51 = vld [vmem:[%s3034_s16 + $0xa8] sm:$0xff] }
 0x122   : > { %2784 = vmatpush1.bf16.msra.mxu1 %v2783_v27  ;;  %1021 = vmatprep.mubr.f32.mxu1 %v2825_v0  ;;  %v2331_v56 = vsub.f32 %v2327_v23, %v2966_v11  ;;  %v3160_v35 = vrot.slane %v1114_v20, %v2969_v12  ;;  %v3163_v38 = vrot.slane %v1115_v24, %v2969_v12  ;;  %v1858_v16 = vand.u32 2147483647, %v1854_v37  ;;  %v2672_v27 = vld [vmem:[%s3034_s16 + $0x88] sm:$0xff] }
 0x123   : > { %2790 = vmatprep.subr.bf16.mxu1 %v2789_v4  ;;  %v2085_v7 = vrot.slane %v2056_v2, %v3043_v34  ;;  %v1860_v44 = vand.u32 2147483647, %v1856_v9  ;;  %v2333_v12 = vand.u32 2147483647, %v2329_v5  ;;  %v3184_v58 = vrot.slane %v1114_v20, %v2999_v26  ;;  %v2703_v5 = vld [vmem:[%s3034_s16 + $0xf0] sm:$0xff] }
 0x124   : > { %2666 = vmatmul.mubr.msk.f32.gmra.mrb[18].mxu0 %vm456_vm4, %v2660_v25  ;;  %v2335_v40 = vand.u32 2147483647, %v2331_v56  ;;  %v1862_v31 = vsub.f32 1.0, %v1858_v16  ;;  %v3187_v61 = vrot.slane %v1115_v24, %v2999_v26  ;;  %v3190_v4 = vrot.slane %v1114_v20, %v2985_v19  ;;  %v2683_v26 = vld [vmem:[%s3034_s16 + $0xb0] sm:$0xff]  ;;  %v2704_v56 = vld [vmem:[%s3034_s16 + $0xf8] sm:$0xff]  ;;  %v2695_v16 = vld [vmem:[%s3034_s16 + $0xe0] sm:$0xff] }
 0x125   : > { %2674 = vmatmul.mubr.msk.f32.gmra.mrb[12].mxu1 %vm456_vm4, %v2668_v29  ;;  %1253 = vmatprep.mubr.f32.mxu0 %v2825_v0  ;;  %v2090_v45 = vsub.f32 %v2085_v7, %v2964_v10  ;;  %v2092_v46 = vsub.f32 %v2085_v7, %v2966_v11  ;;  %v1864_v47 = vsub.f32 1.0, %v1860_v44  ;;  %v2337_v32 = vsub.f32 1.0, %v2333_v12  ;;  %v2706_v12 = vld [vmem:[%s3034_s16 + $0x108] sm:$0xff] }
 0x126   : > { %1027 = vmatprep.mubr.f32.mxu1 %v2825_v0  ;;  %v2339_v8 = vsub.f32 1.0, %v2335_v40  ;;  %v3193_v25 = vrot.slane %v1115_v24, %v2985_v19  ;;  %v1866_v23 = vmax.f32 %v1862_v31, 0.0  ;;  %v2684_v24 = vld [vmem:[%s3034_s16 + $0xb8] sm:$0xff]  ;;  %v2330_v9 = vsub.f32 %v2975_v15, %v2966_v11  ;;  %v2696_v40 = vld [vmem:[%s3034_s16 + $0xe8] sm:$0xff]  ;;  %v2715_v31 = vld [vmem:[%s3034_s16 + $0x120] sm:$0xff] }
 0x127   : > { %v2094_v3 = vand.u32 2147483647, %v2090_v45  ;;  %v2096_v50 = vand.u32 2147483647, %v2092_v46  ;;  %v1868_v29 = vmax.f32 %v1864_v47, 0.0  ;;  %v2341_v30 = vmax.f32 %v2337_v32, 0.0 }
 0x128   : > { %2685 = vmatmul.mubr.msk.f32.vlgmr.msra.gmra.mrb[20].mxu0 %vm456_vm4, %v2679_v28  ;;  %v2343_v59 = vmax.f32 %v2339_v8, 0.0  ;;  %v2692_v28 = vld [vmem:[%s3034_s16 + $0xc8] sm:$0xff]  ;;  %v2334_v7 = vand.u32 2147483647, %v2330_v9  ;;  %v2707_v46 = vld [vmem:[%s3034_s16 + $0x110] sm:$0xff] }
 0x129   : > { %2675 = vmatmul.mubr.msk.f32.gmra.mrb[14].mxu1 %vm456_vm4, %v2669_v39  ;;  %2788 = vmatpush1.bf16.msra.mxu0 %v2787_v21  ;;  %v2098_v1 = vsub.f32 1.0, %v2094_v3  ;;  %v2100_v17 = vsub.f32 1.0, %v2096_v50  ;;  %v2791_v19 = vpack.c.bf16 %v1868_v29, %v1866_v23  ;;  %v2693_v21 = vld [vmem:[%s3034_s16 + $0xd0] sm:$0xff]  ;;  %v2716_v32 = vld [vmem:[%s3034_s16 + $0x128] sm:$0xff]  ;;  %v2728_v3 = vld [vmem:[%s3034_s16 + $0x158] sm:$0xff] }
 0x12a   : > { %2794 = vmatprep.subr.bf16.mxu0 %v2793_v43  ;;  %1033 = vmatprep.mubr.f32.mxu1 %v2825_v0  ;;  %v2797_v20 = vpack.c.bf16 %v2343_v59, %v2341_v30  ;;  %v2328_v43 = vsub.f32 %v2975_v15, %v2964_v10  ;;  %v2705_v15 = vld [vmem:[%s3034_s16 + $0x100] sm:$0xff]  ;;  %v2727_v8 = vld [vmem:[%s3034_s16 + $0x150] sm:$0xff]  ;;  %v2718_v50 = vld [vmem:[%s3034_s16 + $0x138] sm:$0xff] }
 0x12b   : > { %1259 = vmatprep.mubr.f32.mxu0 %v2825_v0  ;;  %v2102_v39 = vmax.f32 %v2098_v1, 0.0  ;;  %v2104_v2 = vmax.f32 %v2100_v17, 0.0  ;;  %v2729_v23 = vld [vmem:[%s3034_s16 + $0x160] sm:$0xff]  ;;  %v2720_v30 = vld [vmem:[%s3034_s16 + $0x148] sm:$0xff]  ;;  %v2731_v59 = vld [vmem:[%s3034_s16 + $0x170] sm:$0xff] }
 0x12c   : > { %2686 = vmatmul.mubr.msk.f32.gmra.mrb[22].mxu0 %vm456_vm4, %v2680_v60  ;;  %v2694_v60 = vld [vmem:[%s3034_s16 + $0xd8] sm:$0xff]  ;;  %v2719_v29 = vld [vmem:[%s3034_s16 + $0x140] sm:$0xff]  ;;  %v2740_v17 = vld [vmem:[%s3034_s16 + $0x188] sm:$0xff] }
 0x12d   : > { %2676 = vmatmul.mubr.msk.f32.gmra.mrb[16].mxu1 %vm456_vm4, %v2670_v63  ;;  %1265 = vmatprep.mubr.f32.mxu0 %v2825_v0  ;;  %v2795_v37 = vpack.c.bf16 %v2104_v2, %v2102_v39  ;;  %v2332_v63 = vand.u32 2147483647, %v2328_v43  ;;  %v2732_v1 = vld [vmem:[%s3034_s16 + $0x178] sm:$0xff]  ;;  %v405_v39 = vrot.slane %v3102_v42, %v3043_v34  ;;  %v409_v2 = vrot.slane %v3113_v57, %v3043_v34 }
 0x12e   : > { %1039 = vmatprep.mubr.f32.mxu1 %v2825_v0  ;;  %v650_v42 = vsub.f32 %v3123_v6, %v2966_v11  ;;  %v649_v57 = vsub.f32 %v3132_v14, %v2964_v10 }
 0x12f   : > { %v2336_v44 = vsub.f32 1.0, %v2332_v63  ;;  %v413_v9 = vsub.f32 %v409_v2, %v2966_v11  ;;  %v651_v63 = vsub.f32 %v3132_v14, %v2966_v11  ;;  %v888_v14 = vsub.f32 %v3150_v18, %v2966_v11 }
 0x130   : > { %2687 = vmatmul.mubr.msk.f32.gmra.mrb[24].mxu0 %vm456_vm4, %v2681_v62  ;;  %v2338_v62 = vsub.f32 1.0, %v2334_v7 }
 0x131   : > { %2677 = vmatmul.mubr.msk.f32.gmra.mrb[18].mxu1 %vm456_vm4, %v2671_v41  ;;  %1271 = vmatprep.mubr.f32.mxu0 %v2825_v0  ;;  %v2340_v41 = vmax.f32 %v2336_v44, 0.0 }
 0x132   : > { %1045 = vmatprep.mubr.f32.mxu1 %v2825_v0  ;;  %v2342_v45 = vmax.f32 %v2338_v62, 0.0 }
 0x134   : > { %2688 = vmatmul.mubr.msk.f32.gmra.mrb[26].mxu0 %vm456_vm4, %v2682_v51  ;;  %v2799_v47 = vpack.c.bf16 %v2342_v45, %v2340_v41  ;;  %v2708_v51 = vld [vmem:[%s3034_s16 + $0x118] sm:$0xff]  ;;  %v653_v41 = vand.u32 2147483647, %v649_v57  ;;  %v655_v45 = vand.u32 2147483647, %v651_v63 }
 0x135   : > { %2678 = vmatmul.mubr.msk.f32.gmra.mrb[20].mxu1 %vm456_vm4, %v2672_v27  ;;  %1277 = vmatprep.mubr.f32.mxu0 %v2825_v0  ;;  %v2717_v27 = vld [vmem:[%s3034_s16 + $0x130] sm:$0xff] }
 0x136   : > { %1487 = vmatprep.mubr.f32.mxu1 %v2825_v0 }
 0x138   : > { %2689 = vmatmul.mubr.msk.f32.gmra.mrb[28].mxu0 %vm456_vm4, %v2683_v26  ;;  %v2730_v26 = vld [vmem:[%s3034_s16 + $0x168] sm:$0xff] }
 0x139   : > { %2697 = vmatmul.mubr.msk.f32.vlgmr.msra.gmra.mrb[22].mxu1 %vm456_vm4, %v2691_v13  ;;  %1283 = vmatprep.mubr.f32.mxu0 %v2825_v0  ;;  %v2739_v13 = vld [vmem:[%s3034_s16 + $0x180] sm:$0xff] }
 0x13a   : > { %2792 = vmatpush1.bf16.msra.mxu1 %v2791_v19  ;;  %1493 = vmatprep.mubr.f32.mxu1 %v2825_v0  ;;  %v2741_v19 = vld [vmem:[%s3034_s16 + $0x190] sm:$0xff] }
 0x13b   : > { %2798 = vmatprep.subr.bf16.mxu1 %v2797_v20  ;;  %v2742_v20 = vld [vmem:[%s3034_s16 + $0x198] sm:$0xff] }
 0x13c   : > { %2690 = vmatmul.mubr.msk.f32.gmra.mrb[30].mxu0 %vm456_vm4, %v2684_v24  ;;  %v2743_v24 = vld [vmem:[%s3034_s16 + $0x1a0] sm:$0xff] }
 0x13d   : > { %2698 = vmatmul.mubr.msk.f32.gmra.mrb[24].mxu1 %vm456_vm4, %v2692_v28  ;;  %1721 = vmatprep.mubr.f32.mxu0 %v2825_v0  ;;  %v2744_v28 = vld [vmem:[%s3034_s16 + $0x1a8] sm:$0xff] }
 0x13e   : > { %1499 = vmatprep.mubr.f32.mxu1 %v2825_v0 }
 0x140   : > { %2709 = vmatmul.mubr.msk.f32.vlgmr.msra.gmra.mrb[32].mxu0 %vm456_vm4, %v2703_v5  ;;  %v410_v5 = vsub.f32 %v405_v39, %v2964_v10 }
 0x141   : > { %2699 = vmatmul.mubr.msk.f32.gmra.mrb[26].mxu1 %vm456_vm4, %v2693_v21  ;;  %2796 = vmatpush1.bf16.msra.mxu0 %v2795_v37  ;;  %v412_v21 = vsub.f32 %v405_v39, %v2966_v11  ;;  %v411_v37 = vsub.f32 %v409_v2, %v2964_v10  ;;  %v1360_v2 = vsub.f32 %v3184_v58, %v2966_v11 }
 0x142   : > { %1505 = vmatprep.mubr.f32.mxu1 %v2825_v0  ;;  %1727 = vmatprep.mubr.f32.mxu0 %v2825_v0  ;;  %v414_v43 = vand.u32 2147483647, %v410_v5 }
 0x144   : > { %2710 = vmatmul.mubr.msk.f32.gmra.mrb[34].mxu0 %vm456_vm4, %v2704_v56  ;;  %v416_v56 = vand.u32 2147483647, %v412_v21  ;;  %v418_v7 = vsub.f32 1.0, %v414_v43 }
 0x145   : > { %2700 = vmatmul.mubr.msk.f32.gmra.mrb[28].mxu1 %vm456_vm4, %v2694_v60  ;;  %1733 = vmatprep.mubr.f32.mxu0 %v2825_v0  ;;  %v415_v60 = vand.u32 2147483647, %v411_v37 }
 0x146   : > { %1511 = vmatprep.mubr.f32.mxu1 %v2825_v0  ;;  %v420_v44 = vsub.f32 1.0, %v416_v56  ;;  %v1592_v56 = vsub.f32 %v3190_v4, %v2964_v10 }
 0x147   : > { %v419_v62 = vsub.f32 1.0, %v415_v60 }
 0x148   : > { %2711 = vmatmul.mubr.msk.f32.gmra.mrb[36].mxu0 %vm456_vm4, %v2705_v15  ;;  %v417_v15 = vand.u32 2147483647, %v413_v9 }
 0x149   : > { %2701 = vmatmul.mubr.msk.f32.gmra.mrb[30].mxu1 %vm456_vm4, %v2695_v16  ;;  %1739 = vmatprep.mubr.f32.mxu0 %v2825_v0 }
 0x14a   : > { %1517 = vmatprep.mubr.f32.mxu1 %v2825_v0 }
 0x14c   : > { %2712 = vmatmul.mubr.msk.f32.gmra.mrb[38].mxu0 %vm456_vm4, %v2706_v12  ;;  %v654_v12 = vand.u32 2147483647, %v650_v42 }
 0x14d   : > { %2702 = vmatmul.mubr.msk.f32.gmra.mrb[32].mxu1 %vm456_vm4, %v2696_v40  ;;  %1745 = vmatprep.mubr.f32.mxu0 %v2825_v0  ;;  %v886_v40 = vsub.f32 %v3150_v18, %v2964_v10  ;;  %v1125_v18 = vsub.f32 %v3163_v38, %v2964_v10 }
 0x14e   : > { %1959 = vmatprep.mubr.f32.mxu1 %v2825_v0 }
 0x150   : > { %2713 = vmatmul.mubr.msk.f32.gmra.mrb[40].mxu0 %vm456_vm4, %v2707_v46  ;;  %v887_v46 = vsub.f32 %v3154_v22, %v2964_v10 }
 0x151   : > { %2721 = vmatmul.mubr.msk.f32.vlgmr.msra.gmra.mrb[34].mxu1 %vm456_vm4, %v2715_v31  ;;  %1751 = vmatprep.mubr.f32.mxu0 %v2825_v0  ;;  %v889_v31 = vsub.f32 %v3154_v22, %v2966_v11  ;;  %v1126_v22 = vsub.f32 %v3160_v35, %v2966_v11 }
 0x152   : > { %2800 = vmatpush1.bf16.msra.mxu1 %v2799_v47  ;;  %1965 = vmatprep.mubr.f32.mxu1 %v2825_v0  ;;  %v3325_v47 = vmax.f32 %v418_v7, 0.0 }
 0x153   : > { %v1130_v39 = vand.u32 2147483647, %v1126_v22 }
 0x154   : > { %2714 = vmatmul.mubr.msk.f32.gmra.mrb[42].mxu0 %vm456_vm4, %v2708_v51  ;;  %v421_v51 = vsub.f32 1.0, %v417_v15  ;;  %v1364_v15 = vand.u32 2147483647, %v1360_v2 }
 0x155   : > { %2722 = vmatmul.mubr.msk.f32.gmra.mrb[36].mxu1 %vm456_vm4, %v2716_v32  ;;  %2195 = vmatprep.mubr.f32.mxu0 %v2825_v0  ;;  %v1134_v7 = vsub.f32 1.0, %v1130_v39  ;;  %v2067_v39 = vsub.f32 %v2933_v53, %v2964_v10 }
 0x156   : > { %1971 = vmatprep.mubr.f32.mxu1 %v2825_v0 }
 0x158   : > { %2733 = vmatmul.mubr.msk.f32.vlgmr.msra.gmra.mrb[44].mxu0 %vm456_vm4, %v2727_v8  ;;  %v1124_v8 = vsub.f32 %v3160_v35, %v2964_v10  ;;  %v1358_v35 = vsub.f32 %v3184_v58, %v2964_v10  ;;  %v1593_v58 = vsub.f32 %v3193_v25, %v2964_v10 }
 0x159   : > { %2723 = vmatmul.mubr.msk.f32.gmra.mrb[38].mxu1 %vm456_vm4, %v2717_v27  ;;  %2201 = vmatprep.mubr.f32.mxu0 %v2825_v0  ;;  %v3329_v27 = vmax.f32 %v420_v44, 0.0 }
 0x15a   : > { %1977 = vmatprep.mubr.f32.mxu1 %v2825_v0  ;;  %v1362_v42 = vand.u32 2147483647, %v1358_v35 }
 0x15c   : > { %2734 = vmatmul.mubr.msk.f32.gmra.mrb[46].mxu0 %vm456_vm4, %v2728_v3  ;;  %v890_v3 = vand.u32 2147483647, %v886_v40 }
 0x15d   : > { %2724 = vmatmul.mubr.msk.f32.gmra.mrb[40].mxu1 %vm456_vm4, %v2718_v50  ;;  %2207 = vmatprep.mubr.f32.mxu0 %v2825_v0  ;;  %v657_v50 = vsub.f32 1.0, %v653_v41 }
 0x15e   : > { %1983 = vmatprep.mubr.f32.mxu1 %v2825_v0 }
 0x160   : > { %2735 = vmatmul.mubr.msk.f32.gmra.mrb[48].mxu0 %vm456_vm4, %v2729_v23  ;;  %v659_v23 = vsub.f32 1.0, %v655_v45 }
 0x161   : > { %2725 = vmatmul.mubr.msk.f32.gmra.mrb[42].mxu1 %vm456_vm4, %v2719_v29  ;;  %2213 = vmatprep.mubr.f32.mxu0 %v2825_v0  ;;  %v3339_v29 = vadd.f32 %v2906_v36, %v2935_v54  ;;  %v1359_v36 = vsub.f32 %v3187_v61, %v2964_v10  ;;  %v3353_v54 = vmax.f32 %v657_v50, 0.0 }
 0x162   : > { %1989 = vmatprep.mubr.f32.mxu1 %v2825_v0  ;;  %v3357_v5 = vmax.f32 %v659_v23, 0.0  ;;  %v1831_v23 = vsub.f32 %v2930_v52, %v2964_v10 }
 0x163   : > { %v1363_v57 = vand.u32 2147483647, %v1359_v36 }
 0x164   : > { %2736 = vmatmul.mubr.msk.f32.gmra.mrb[50].mxu0 %vm456_vm4, %v2730_v26  ;;  %v891_v26 = vand.u32 2147483647, %v887_v46  ;;  %v1596_v46 = vand.u32 2147483647, %v1592_v56 }
 0x165   : > { %2726 = vmatmul.mubr.msk.f32.gmra.mrb[44].mxu1 %vm456_vm4, %v2720_v30  ;;  %2219 = vmatprep.mubr.f32.mxu0 %v2825_v0  ;;  %v892_v30 = vand.u32 2147483647, %v888_v14 }
 0x166   : > { %2433 = vmatprep.mubr.f32.mxu1 %v2825_v0  ;;  %v895_v21 = vsub.f32 1.0, %v891_v26 }
 0x168   : > { %2737 = vmatmul.mubr.msk.f32.gmra.mrb[52].mxu0 %vm456_vm4, %v2731_v59  ;;  %v893_v59 = vand.u32 2147483647, %v889_v31  ;;  %v3369_v44 = vmax.f32 %v895_v21, 0.0  ;;  %v1366_v31 = vsub.f32 1.0, %v1362_v42  ;;  %v2069_v42 = vsub.f32 %v2933_v53, %v2966_v11 }
 0x169   : > { %2745 = vmatmul.mubr.msk.f32.vlgmr.msra.gmra.mrb[46].mxu1 %vm456_vm4, %v2739_v13  ;;  %2225 = vmatprep.mubr.f32.mxu0 %v2825_v0  ;;  %v3341_v13 = vmax.f32 %v421_v51, 0.0  ;;  %v1367_v51 = vsub.f32 1.0, %v1363_v57 }
 0x16a   : > { %2439 = vmatprep.mubr.f32.mxu1 %v2825_v0  ;;  %v897_v37 = vsub.f32 1.0, %v893_v59  ;;  %v1833_v59 = vsub.f32 %v2930_v52, %v2966_v11  ;;  %v1835_v52 = vand.u32 2147483647, %v1831_v23 }
 0x16c   : > { %2738 = vmatmul.mubr.msk.f32.gmra.mrb[54].mxu0 %vm456_vm4, %v2732_v1  ;;  %v3377_v40 = vmax.f32 %v897_v37, 0.0 }
 0x16d   : > { %2746 = vmatmul.mubr.msk.f32.gmra.mrb[48].mxu1 %vm456_vm4, %v2740_v17  ;;  %v1128_v17 = vand.u32 2147483647, %v1124_v8  ;;  %v3383_v8 = vmax.f32 %v1134_v7, 0.0  ;;  %v2071_v7 = vand.u32 2147483647, %v2067_v39 }
 0x16e   : > { %2445 = vmatprep.mubr.f32.mxu1 %v2825_v0 }
 0x16f   : > { %v1132_v43 = vsub.f32 1.0, %v1128_v17  ;;  %v3393_v17 = vmax.f32 %v1366_v31, 0.0 }
 0x171   : > { %2747 = vmatmul.mubr.msk.f32.gmra.mrb[50].mxu1 %vm456_vm4, %v2741_v19  ;;  %v1127_v19 = vsub.f32 %v3163_v38, %v2966_v11  ;;  %v896_v38 = vsub.f32 1.0, %v892_v30  ;;  %v3379_v14 = vmax.f32 %v1132_v43, 0.0  ;;  %v1600_v30 = vsub.f32 1.0, %v1596_v46 }
 0x172   : > { %2451 = vmatprep.mubr.f32.mxu1 %v2825_v0  ;;  %v1837_v43 = vand.u32 2147483647, %v1833_v59 }
 0x173   : > { %v1131_v9 = vand.u32 2147483647, %v1127_v19  ;;  %v3395_v19 = vmax.f32 %v1367_v51, 0.0 }
 0x174   : > { %v1841_v53 = vsub.f32 1.0, %v1837_v43 }
 0x175   : > { %2748 = vmatmul.mubr.msk.f32.gmra.mrb[52].mxu1 %vm456_vm4, %v2742_v20  ;;  %v1135_v41 = vsub.f32 1.0, %v1131_v9  ;;  %v2068_v9 = vsub.f32 %v2927_v49, %v2966_v11 }
 0x176   : > { %2457 = vmatprep.mubr.f32.mxu1 %v2825_v0 }
 0x177   : > { %v3389_v22 = vmax.f32 %v1135_v41, 0.0  ;;  %v2072_v46 = vand.u32 2147483647, %v2068_v9 }
 0x179   : > { %2749 = vmatmul.mubr.msk.f32.gmra.mrb[54].mxu1 %vm456_vm4, %v2743_v24  ;;  %v894_v24 = vsub.f32 1.0, %v890_v3  ;;  %v2076_v39 = vsub.f32 1.0, %v2072_v46 }
 0x17a   : > { %2463 = vmatprep.mubr.f32.mxu1 %v2825_v0  ;;  %v648_v0 = vsub.f32 %v3123_v6, %v2964_v10  ;;  %v3317_v6 = vadd.f32 %v2902_v33, %v2937_v55  ;;  %v3331_v33 = vmax.f32 %v419_v62, 0.0  ;;  %v658_v55 = vsub.f32 1.0, %v654_v12 }
 0x17b   : > { %v3363_v60 = vmax.f32 %v894_v24, 0.0  ;;  %v3371_v62 = vmax.f32 %v896_v38, 0.0  ;;  %v1830_v12 = vsub.f32 %v2924_v48, %v2964_v10 }
 0x17c   : > { %v652_v16 = vand.u32 2147483647, %v648_v0  ;;  %v3347_v20 = vmax.f32 %v658_v55, 0.0  ;;  %v1361_v0 = vsub.f32 %v3187_v61, %v2966_v11  ;;  %v1595_v61 = vsub.f32 %v3193_v25, %v2966_v11 }
 0x17d   : > { %2750 = vmatmul.mubr.msk.f32.gmra.mrb[56].mxu1 %vm456_vm4, %v2744_v28  ;;  %v1129_v28 = vand.u32 2147483647, %v1125_v18  ;;  %v1368_v55 = vsub.f32 1.0, %v1364_v15  ;;  %v1834_v50 = vand.u32 2147483647, %v1830_v12  ;;  %v1832_v18 = vsub.f32 %v2924_v48, %v2966_v11 }
 0x17e   : > { %v656_v32 = vsub.f32 1.0, %v652_v16  ;;  %v1594_v16 = vsub.f32 %v3190_v4, %v2966_v11  ;;  %v1365_v45 = vand.u32 2147483647, %v1361_v0  ;;  %v1597_v4 = vand.u32 2147483647, %v1593_v58 }
 0x17f   : > { %v1133_v63 = vsub.f32 1.0, %v1129_v28  ;;  %v1599_v25 = vand.u32 2147483647, %v1595_v61  ;;  %v2299_v35 = vrot.slane %v3317_v6, %v3043_v34  ;;  %v3399_v36 = vmax.f32 %v1368_v55, 0.0 }
 0x180   : > { %v3343_v1 = vmax.f32 %v656_v32, 0.0  ;;  %v1598_v3 = vand.u32 2147483647, %v1594_v16  ;;  %v1369_v26 = vsub.f32 1.0, %v1365_v45  ;;  %v1601_v24 = vsub.f32 1.0, %v1597_v4 }
 0x181   : > { %v3381_v32 = vmax.f32 %v1133_v63, 0.0  ;;  %v2066_v48 = vsub.f32 %v2927_v49, %v2964_v10  ;;  %v1603_v2 = vsub.f32 1.0, %v1599_v25  ;;  %v1838_v21 = vsub.f32 1.0, %v1834_v50 }
 0x182   : > { %v1602_v28 = vsub.f32 1.0, %v1598_v3  ;;  %v1836_v38 = vand.u32 2147483647, %v1832_v18  ;;  %v3405_v37 = vmax.f32 %v1369_v26, 0.0  ;;  %v2303_v6 = vrot.slane %v3339_v29, %v3043_v34 }
 0x183   : > { %v3411_v0 = vmax.f32 %v1600_v30, 0.0  ;;  %v3413_v56 = vmax.f32 %v1601_v24, 0.0  ;;  %v2304_v57 = vsub.f32 %v2299_v35, %v2964_v10  ;;  %v2070_v63 = vand.u32 2147483647, %v2066_v48 }
 0x184   : > { %v3418_v58 = vmax.f32 %v1602_v28, 0.0  ;;  %v2306_v15 = vsub.f32 %v2299_v35, %v2966_v11  ;;  %v3421_v49 = vmax.f32 %v1603_v2, 0.0  ;;  %v3423_v61 = vmax.f32 %v1838_v21, 0.0 }
 0x185   : > { %v1839_v34 = vsub.f32 1.0, %v1835_v52  ;;  %v1840_v29 = vsub.f32 1.0, %v1836_v38  ;;  %v2305_v31 = vsub.f32 %v2303_v6, %v2964_v10  ;;  %v2073_v3 = vand.u32 2147483647, %v2069_v42 }
 0x186   : > { %v2308_v25 = vand.u32 2147483647, %v2304_v57  ;;  %v2074_v23 = vsub.f32 1.0, %v2070_v63  ;;  %v2075_v18 = vsub.f32 1.0, %v2071_v7  ;;  %v2310_v26 = vand.u32 2147483647, %v2306_v15 }
 0x187   : > { %v3430_v59 = vmax.f32 %v1839_v34, 0.0  ;;  %v3432_v24 = vmax.f32 %v1840_v29, 0.0  ;;  %v2307_v35 = vsub.f32 %v2303_v6, %v2966_v11  ;;  %v3435_v48 = vmax.f32 %v1841_v53, 0.0 }
 0x188   : > { %v2309_v2 = vand.u32 2147483647, %v2305_v31  ;;  %v2077_v9 = vsub.f32 1.0, %v2073_v3  ;;  %v2312_v42 = vsub.f32 1.0, %v2308_v25  ;;  %v2314_v11 = vsub.f32 1.0, %v2310_v26 }
 0x189   : > { %v3441_v34 = vmax.f32 %v2074_v23, 0.0  ;;  %v2311_v29 = vand.u32 2147483647, %v2307_v35  ;;  %v3445_v53 = vmax.f32 %v2076_v39, 0.0 }
 0x18a   : > { %v2313_v46 = vsub.f32 1.0, %v2309_v2  ;;  %v3448_v3 = vmax.f32 %v2077_v9, 0.0  ;;  %v3450_v25 = vmax.f32 %v2312_v42, 0.0 }
 0x18b   : > { %3800 = vst [vmem:[#allocation2_spill] sm:$0xff] %v3441_v34  ;;  %3802 = vst [vmem:[#allocation4_spill] sm:$0xff] %v3445_v53  ;;  %v2315_v39 = vsub.f32 1.0, %v2311_v29 }
 0x18c   : > { %3803 = vst [vmem:[#allocation5_spill] sm:$0xff] %v3448_v3  ;;  %3804 = vst [vmem:[#allocation6_spill] sm:$0xff] %v3450_v25  ;;  %v3457_v9 = vmax.f32 %v2313_v46, 0.0 }
 0x18e   : > { %3806 = vst [vmem:[#allocation8_spill] sm:$0xff] %v3457_v9 }
 0x1dd   : > { %v541_v16 = vpop.f32.mrb[6].mxu0 }
 0x1de   : > { %v576_v12 = vmul.f32 %v541_v16, %v3325_v47  ;;  %v547_v41 = vpop.f32.mrb[0].mxu1  ;;  %v543_v45 = vpop.f32.mrb[7].mxu0 }
 0x1df   : > { %v578_v51 = vmul.f32 %v547_v41, %v3329_v27  ;;  %v577_v4 = vmul.f32 %v543_v45, %v3331_v33  ;;  %v549_v55 = vpop.f32.mrb[1].mxu1  ;;  %v3443_v45 = vmax.f32 %v2075_v18, 0.0  ;;  %v3454_v18 = vmax.f32 %v2314_v11, 0.0 }
 0x1e0   : > { %v579_v50 = vmul.f32 %v549_v55, %v3341_v13 }
 0x1e1   : > { %v588_v30 = vadd.f32 %v578_v51, %v576_v12  ;;  %3801 = vst [vmem:[#allocation3_spill] sm:$0xff] %v3443_v45  ;;  %3805 = vst [vmem:[#allocation7_spill] sm:$0xff] %v3454_v18 }
 0x1e2   : > { %v595_v10 = vadd.f32 %v579_v50, %v577_v4 }
 0x1e3   : > { %v779_v28 = vpop.f32.mrb[8].mxu0  ;;  %v589_v21 = vrot.slane %v588_v30, 4  ;;  %v553_v52 = vpop.f32.mrb[2].mxu1 }
 0x1e4   : > { %v814_v38 = vmul.f32 %v779_v28, %v3343_v1  ;;  %v781_v43 = vpop.f32.mrb[9].mxu0  ;;  %v596_v57 = vrot.slane %v595_v10, 4  ;;  %v580_v63 = vmul.f32 %v553_v52, %v3325_v47  ;;  %v555_v7 = vpop.f32.mrb[3].mxu1 }
 0x1e5   : > { %v815_v15 = vmul.f32 %v781_v43, %v3353_v54  ;;  %v590_v6 = vadd.f32 %v589_v21, %v588_v30  ;;  %v581_v16 = vmul.f32 %v555_v7, %v3331_v33 }
 0x1e6   : > { %v597_v12 = vadd.f32 %v596_v57, %v595_v10 }
 0x1e7   : > { %v785_v41 = vpop.f32.mrb[10].mxu0  ;;  %v591_v31 = vrot.slane %v590_v6, 2 }
 0x1e8   : > { %v559_v51 = vpop.f32.mrb[4].mxu1  ;;  %v816_v4 = vmul.f32 %v785_v41, %v3347_v20  ;;  %v787_v55 = vpop.f32.mrb[11].mxu0  ;;  %v598_v50 = vrot.slane %v597_v12, 2 }
 0x1e9   : > { %v582_v23 = vmul.f32 %v559_v51, %v3329_v27  ;;  %v561_v26 = vpop.f32.mrb[5].mxu1  ;;  %v817_v30 = vmul.f32 %v787_v55, %v3357_v5  ;;  %v592_v35 = vadd.f32 %v591_v31, %v590_v6 }
 0x1ea   : > { %v826_v10 = vadd.f32 %v816_v4, %v814_v38  ;;  %v583_v28 = vmul.f32 %v561_v26, %v3341_v13  ;;  %v599_v2 = vadd.f32 %v598_v50, %v597_v12 }
 0x1eb   : > { %v602_v21 = vadd.f32 %v582_v23, %v580_v63  ;;  %v833_v52 = vadd.f32 %v817_v30, %v815_v15  ;;  %v791_v43 = vpop.f32.mrb[12].mxu0  ;;  %v593_v42 = vrot.slane %v592_v35, 1  ;;  %v3462_v15 = vmax.f32 %v2315_v39, 0.0 }
 0x1ec   : > { %v827_v57 = vrot.slane %v826_v10, 4  ;;  %v609_v7 = vadd.f32 %v583_v28, %v581_v16  ;;  %v565_v41 = vpop.f32.mrb[6].mxu1  ;;  %v818_v51 = vmul.f32 %v791_v43, %v3343_v1  ;;  %v793_v55 = vpop.f32.mrb[13].mxu0  ;;  %v600_v11 = vrot.slane %v599_v2, 1 }
 0x1ed   : > { %v603_v18 = vrot.slane %v602_v21, 4  ;;  %v834_v6 = vrot.slane %v833_v52, 4  ;;  %v584_v38 = vmul.f32 %v565_v41, %v3325_v47  ;;  %v567_v31 = vpop.f32.mrb[7].mxu1  ;;  %3807 = vst [vmem:[#allocation9_spill] sm:$0xff] %v3462_v15  ;;  %v594_v46 = vadd.f32 %v593_v42, %v592_v35 }
 0x1ee   : > { %v828_v29 = vadd.f32 %v827_v57, %v826_v10  ;;  %v610_v12 = vrot.slane %v609_v7, 4  ;;  %v585_v63 = vmul.f32 %v567_v31, %v3331_v33  ;;  %v819_v16 = vmul.f32 %v793_v55, %v3353_v54 }
 0x1ef   : > { %v604_v4 = vadd.f32 %v603_v18, %v602_v21  ;;  %v835_v50 = vadd.f32 %v834_v6, %v833_v52  ;;  %v797_v23 = vpop.f32.mrb[14].mxu0  ;;  %v601_v26 = vadd.f32 %v600_v11, %v599_v2 }
 0x1f0   : > { %v829_v30 = vrot.slane %v828_v29, 2  ;;  %v611_v28 = vadd.f32 %v610_v12, %v609_v7  ;;  %v571_v43 = vpop.f32.mrb[8].mxu1  ;;  %v820_v9 = vmul.f32 %v797_v23, %v3347_v20  ;;  %v799_v47 = vpop.f32.mrb[15].mxu0 }
 0x1f1   : > { %v605_v41 = vrot.slane %v604_v4, 2  ;;  %v836_v10 = vrot.slane %v835_v50, 2  ;;  %v586_v57 = vmul.f32 %v571_v43, %v3329_v27  ;;  %v573_v33 = vpop.f32.mrb[9].mxu1  ;;  %v821_v39 = vmul.f32 %v799_v47, %v3357_v5 }
 0x1f2   : > { %v830_v35 = vadd.f32 %v829_v30, %v828_v29  ;;  %v612_v18 = vrot.slane %v611_v28, 2  ;;  %v840_v21 = vadd.f32 %v820_v9, %v818_v51  ;;  %v587_v52 = vmul.f32 %v573_v33, %v3341_v13 }
 0x1f3   : > { %v606_v42 = vadd.f32 %v605_v41, %v604_v4  ;;  %v837_v2 = vadd.f32 %v836_v10, %v835_v50  ;;  %v616_v55 = vadd.f32 %v586_v57, %v584_v38  ;;  %v847_v7 = vadd.f32 %v821_v39, %v819_v16  ;;  %v803_v11 = vpop.f32.mrb[16].mxu0 }
 0x1f4   : > { %v831_v6 = vrot.slane %v830_v35, 1  ;;  %v613_v31 = vadd.f32 %v612_v18, %v611_v28  ;;  %v841_v12 = vrot.slane %v840_v21, 4  ;;  %v623_v23 = vadd.f32 %v587_v52, %v585_v63  ;;  %v1017_v15 = vpop.f32.mrb[10].mxu1  ;;  %v805_v25 = vpop.f32.mrb[17].mxu0 }
 0x1f5   : > { %v607_v27 = vrot.slane %v606_v42, 1  ;;  %v838_v43 = vrot.slane %v837_v2, 1  ;;  %v617_v3 = vrot.slane %v616_v55, 4  ;;  %v848_v47 = vrot.slane %v847_v7, 4  ;;  %v1019_v29 = vpop.f32.mrb[11].mxu1 }
 0x1f6   : > { %v832_v30 = vadd.f32 %v831_v6, %v830_v35  ;;  %v614_v9 = vrot.slane %v613_v31, 1  ;;  %v842_v51 = vadd.f32 %v841_v12, %v840_v21  ;;  %v624_v13 = vrot.slane %v623_v23, 4 }
 0x1f7   : > { %v608_v4 = vadd.f32 %v607_v27, %v606_v42  ;;  %v839_v50 = vadd.f32 %v838_v43, %v837_v2  ;;  %v618_v38 = vadd.f32 %v617_v3, %v616_v55  ;;  %v849_v16 = vadd.f32 %v848_v47, %v847_v7  ;;  %v809_v41 = vpop.f32.mrb[18].mxu0 }
 0x1f8   : > { %v3469_v10 = vadd.f32 %v832_v30, %v594_v46  ;;  %v615_v28 = vadd.f32 %v614_v9, %v613_v31  ;;  %v843_v63 = vrot.slane %v842_v51, 2  ;;  %v625_v57 = vadd.f32 %v624_v13, %v623_v23  ;;  %v1023_v33 = vpop.f32.mrb[12].mxu1  ;;  %v811_v39 = vpop.f32.mrb[19].mxu0 }
 0x1f9   : > { %v3471_v18 = vadd.f32 %v839_v50, %v601_v26  ;;  %v619_v52 = vrot.slane %v618_v38, 2  ;;  %v850_v53 = vrot.slane %v849_v16, 2  ;;  %v822_v35 = vmul.f32 %v803_v11, %v3343_v1  ;;  %v1025_v21 = vpop.f32.mrb[13].mxu1 }
 0x1fa   : > { %v844_v6 = vadd.f32 %v843_v63, %v842_v51  ;;  %v626_v42 = vrot.slane %v625_v57, 2  ;;  %v1052_v3 = vmul.f32 %v1017_v15, %v3363_v60  ;;  %v823_v2 = vmul.f32 %v805_v25, %v3353_v54 }
 0x1fb   : > { %v620_v46 = vadd.f32 %v619_v52, %v618_v38  ;;  %v851_v55 = vadd.f32 %v850_v53, %v849_v16  ;;  %v1053_v7 = vmul.f32 %v1019_v29, %v3369_v44  ;;  %v824_v31 = vmul.f32 %v809_v41, %v3347_v20  ;;  %v1255_v12 = vpop.f32.mrb[20].mxu0 }
 0x1fc   : > { %v845_v26 = vrot.slane %v844_v6, 1  ;;  %v627_v23 = vadd.f32 %v626_v42, %v625_v57  ;;  %v1054_v27 = vmul.f32 %v1023_v33, %v3371_v62  ;;  %v825_v1 = vmul.f32 %v811_v39, %v3357_v5  ;;  %v1029_v11 = vpop.f32.mrb[14].mxu1  ;;  %v1257_v43 = vpop.f32.mrb[21].mxu0 }
 0x1fd   : > { %v621_v47 = vrot.slane %v620_v46, 1  ;;  %v852_v30 = vrot.slane %v851_v55, 1  ;;  %v854_v15 = vadd.f32 %v824_v31, %v822_v35  ;;  %v1055_v54 = vmul.f32 %v1025_v21, %v3377_v40  ;;  %v1031_v25 = vpop.f32.mrb[15].mxu1 }
 0x1fe   : > { %v846_v53 = vadd.f32 %v845_v26, %v844_v6  ;;  %v628_v9 = vrot.slane %v627_v23, 1  ;;  %v1064_v29 = vadd.f32 %v1054_v27, %v1052_v3  ;;  %v861_v51 = vadd.f32 %v825_v1, %v823_v2 }
 0x1ff   : > { %v622_v20 = vadd.f32 %v621_v47, %v620_v46  ;;  %v853_v13 = vadd.f32 %v852_v30, %v851_v55  ;;  %v855_v50 = vrot.slane %v854_v15, 4  ;;  %v1071_v38 = vadd.f32 %v1055_v54, %v1053_v7  ;;  %v1261_v16 = vpop.f32.mrb[22].mxu0 }
 0x200   : > { %v3481_v41 = vadd.f32 %v846_v53, %v608_v4  ;;  %v629_v5 = vadd.f32 %v628_v9, %v627_v23  ;;  %v1065_v63 = vrot.slane %v1064_v29, 4  ;;  %v862_v57 = vrot.slane %v861_v51, 4  ;;  %v1035_v33 = vpop.f32.mrb[16].mxu1  ;;  %v1263_v39 = vpop.f32.mrb[23].mxu0 }
 0x201   : > { %v3483_v52 = vadd.f32 %v853_v13, %v615_v28  ;;  %v856_v35 = vadd.f32 %v855_v50, %v854_v15  ;;  %v1072_v21 = vrot.slane %v1071_v38, 4  ;;  %v1056_v6 = vmul.f32 %v1029_v11, %v3363_v60  ;;  %v1037_v42 = vpop.f32.mrb[17].mxu1 }
 0x202   : > { %v1066_v3 = vadd.f32 %v1065_v63, %v1064_v29  ;;  %v863_v2 = vadd.f32 %v862_v57, %v861_v51  ;;  %v1290_v46 = vmul.f32 %v1255_v12, %v3379_v14  ;;  %v1057_v55 = vmul.f32 %v1031_v25, %v3369_v44 }
 0x203   : > { %v857_v4 = vrot.slane %v856_v35, 2  ;;  %v1073_v7 = vadd.f32 %v1072_v21, %v1071_v38  ;;  %v1291_v31 = vmul.f32 %v1257_v43, %v3381_v32  ;;  %v1058_v26 = vmul.f32 %v1035_v33, %v3371_v62  ;;  %v1267_v23 = vpop.f32.mrb[24].mxu0 }
 0x204   : > { %v1067_v28 = vrot.slane %v1066_v3, 2  ;;  %v864_v27 = vrot.slane %v863_v2, 2  ;;  %v1292_v1 = vmul.f32 %v1261_v16, %v3383_v8  ;;  %v1059_v11 = vmul.f32 %v1037_v42, %v3377_v40  ;;  %v1041_v47 = vpop.f32.mrb[18].mxu1  ;;  %v1269_v30 = vpop.f32.mrb[25].mxu0 }
 0x205   : > { %v858_v15 = vadd.f32 %v857_v4, %v856_v35  ;;  %v1074_v54 = vrot.slane %v1073_v7, 2  ;;  %v1078_v12 = vadd.f32 %v1058_v26, %v1056_v6  ;;  %v1293_v25 = vmul.f32 %v1263_v39, %v3389_v22  ;;  %v1043_v53 = vpop.f32.mrb[19].mxu1 }
 0x206   : > { %v1068_v9 = vadd.f32 %v1067_v28, %v1066_v3  ;;  %v865_v29 = vadd.f32 %v864_v27, %v863_v2  ;;  %v1302_v43 = vadd.f32 %v1292_v1, %v1290_v46  ;;  %v1085_v51 = vadd.f32 %v1059_v11, %v1057_v55 }
 0x207   : > { %v859_v13 = vrot.slane %v858_v15, 1  ;;  %v1075_v50 = vadd.f32 %v1074_v54, %v1073_v7  ;;  %v1079_v38 = vrot.slane %v1078_v12, 4  ;;  %v1309_v63 = vadd.f32 %v1293_v25, %v1291_v31  ;;  %v1273_v57 = vpop.f32.mrb[26].mxu0 }
 0x208   : > { %v1069_v16 = vrot.slane %v1068_v9, 1  ;;  %v866_v33 = vrot.slane %v865_v29, 1  ;;  %v1303_v21 = vrot.slane %v1302_v43, 4  ;;  %v1086_v42 = vrot.slane %v1085_v51, 4  ;;  %v1047_v45 = vpop.f32.mrb[20].mxu1  ;;  %v1275_v35 = vpop.f32.mrb[27].mxu0 }
 0x209   : > { %v860_v4 = vadd.f32 %v859_v13, %v858_v15  ;;  %v1076_v6 = vrot.slane %v1075_v50, 1  ;;  %v1080_v26 = vadd.f32 %v1079_v38, %v1078_v12  ;;  %v1310_v39 = vrot.slane %v1309_v63, 4  ;;  %v1049_v34 = vpop.f32.mrb[21].mxu1 }
 0x20a   : > { %v1070_v3 = vadd.f32 %v1069_v16, %v1068_v9  ;;  %v867_v2 = vadd.f32 %v866_v33, %v865_v29  ;;  %v1304_v46 = vadd.f32 %v1303_v21, %v1302_v43  ;;  %v1087_v55 = vadd.f32 %v1086_v42, %v1085_v51 }
 0x20b   : > { %v3493_v28 = vadd.f32 %v860_v4, %v622_v20  ;;  %v1077_v7 = vadd.f32 %v1076_v6, %v1075_v50  ;;  %v1081_v31 = vrot.slane %v1080_v26, 2  ;;  %v1311_v27 = vadd.f32 %v1310_v39, %v1309_v63  ;;  %v1279_v1 = vpop.f32.mrb[28].mxu0 }
 0x20c   : > { %v1106_v11 = vadd.f32 %v1070_v3, %v3469_v10  ;;  %v3496_v54 = vadd.f32 %v867_v2, %v629_v5  ;;  %v1305_v25 = vrot.slane %v1304_v46, 2  ;;  %v1088_v15 = vrot.slane %v1087_v55, 2  ;;  %v1489_v13 = vpop.f32.mrb[22].mxu1  ;;  %v1281_v12 = vpop.f32.mrb[29].mxu0 }
 0x20d   : > { %v1107_v38 = vadd.f32 %v1077_v7, %v3471_v18  ;;  %v1082_v9 = vadd.f32 %v1081_v31, %v1080_v26  ;;  %v1312_v29 = vrot.slane %v1311_v27, 2  ;;  %v1060_v43 = vmul.f32 %v1041_v47, %v3363_v60  ;;  %v1491_v20 = vpop.f32.mrb[23].mxu1 }
 0x20e   : > { %v1306_v51 = vadd.f32 %v1305_v25, %v1304_v46  ;;  %v1089_v50 = vadd.f32 %v1088_v15, %v1087_v55  ;;  %v1294_v63 = vmul.f32 %v1267_v23, %v3379_v14  ;;  %v1061_v16 = vmul.f32 %v1043_v53, %v3369_v44 }
 0x20f   : > { %v1083_v10 = vrot.slane %v1082_v9, 1  ;;  %v1313_v5 = vadd.f32 %v1312_v29, %v1311_v27  ;;  %v1295_v33 = vmul.f32 %v1269_v30, %v3381_v32  ;;  %v1062_v21 = vmul.f32 %v1047_v45, %v3371_v62  ;;  %v1285_v42 = vpop.f32.mrb[30].mxu0 }
 0x210   : > { %v1307_v4 = vrot.slane %v1306_v51, 1  ;;  %v1090_v18 = vrot.slane %v1089_v50, 1  ;;  %v1296_v6 = vmul.f32 %v1273_v57, %v3383_v8  ;;  %v1063_v60 = vmul.f32 %v1049_v34, %v3377_v40  ;;  %v1495_v47 = vpop.f32.mrb[24].mxu1  ;;  %v1287_v26 = vpop.f32.mrb[31].mxu0 }
 0x211   : > { %v1084_v39 = vadd.f32 %v1083_v10, %v1082_v9  ;;  %v1314_v3 = vrot.slane %v1313_v5, 1  ;;  %v1092_v23 = vadd.f32 %v1062_v21, %v1060_v43  ;;  %v1297_v44 = vmul.f32 %v1275_v35, %v3389_v22  ;;  %v1497_v53 = vpop.f32.mrb[25].mxu1 }
 0x212   : > { %v1308_v2 = vadd.f32 %v1307_v4, %v1306_v51  ;;  %v1091_v46 = vadd.f32 %v1090_v18, %v1089_v50  ;;  %v1316_v30 = vadd.f32 %v1296_v6, %v1294_v63  ;;  %v1099_v55 = vadd.f32 %v1063_v60, %v1061_v16 }
 0x213   : > { %v3508_v62 = vadd.f32 %v1084_v39, %v3481_v41  ;;  %v1315_v45 = vadd.f32 %v1314_v3, %v1313_v5  ;;  %v1093_v7 = vrot.slane %v1092_v23, 4  ;;  %v1323_v57 = vadd.f32 %v1297_v44, %v1295_v33  ;;  %v3510_v31 = vpop.f32.mrb[32].mxu0 }
 0x214   : > { %v3512_v40 = vadd.f32 %v1308_v2, %v1106_v11  ;;  %v3515_v34 = vadd.f32 %v1091_v46, %v3483_v52  ;;  %v1317_v27 = vrot.slane %v1316_v30, 4  ;;  %v1100_v35 = vrot.slane %v1099_v55, 4  ;;  %v3517_v25 = vpop.f32.mrb[26].mxu1  ;;  %v3519_v15 = vpop.f32.mrb[33].mxu0 }
 0x215   : > { %v3521_v9 = vadd.f32 %v1315_v45, %v1107_v38  ;;  %v1094_v41 = vadd.f32 %v1093_v7, %v1092_v23  ;;  %v1324_v29 = vrot.slane %v1323_v57, 4  ;;  %v1298_v43 = vmul.f32 %v1279_v1, %v3379_v14  ;;  %v3524_v51 = vpop.f32.mrb[27].mxu1 }
 0x216   : > { %v1318_v50 = vadd.f32 %v1317_v27, %v1316_v30  ;;  %v1101_v11 = vadd.f32 %v1100_v35, %v1099_v55  ;;  %v1524_v63 = vmul.f32 %v1489_v13, %v3393_v17  ;;  %v1299_v52 = vmul.f32 %v1281_v12, %v3381_v32 }
 0x217   : > { %v1095_v16 = vrot.slane %v1094_v41, 2  ;;  %v1325_v10 = vadd.f32 %v1324_v29, %v1323_v57  ;;  %v1525_v5 = vmul.f32 %v1491_v20, %v3395_v19  ;;  %v1300_v33 = vmul.f32 %v1285_v42, %v3383_v8  ;;  %v3530_v38 = vpop.f32.mrb[34].mxu0 }
 0x218   : > { %v1319_v21 = vrot.slane %v1318_v50, 2  ;;  %v1102_v4 = vrot.slane %v1101_v11, 2  ;;  %v1526_v14 = vmul.f32 %v1495_v47, %v3399_v36  ;;  %v1301_v1 = vmul.f32 %v1287_v26, %v3389_v22  ;;  %v1507_v18 = vpop.f32.mrb[28].mxu1  ;;  %v3534_v6 = vpop.f32.mrb[35].mxu0 }
 0x219   : > { %v1096_v13 = vadd.f32 %v1095_v16, %v1094_v41  ;;  %v1326_v60 = vrot.slane %v1325_v10, 2  ;;  %v1330_v32 = vadd.f32 %v1300_v33, %v1298_v43  ;;  %v1527_v12 = vmul.f32 %v1497_v53, %v3405_v37  ;;  %v1509_v39 = vpop.f32.mrb[29].mxu1 }
 0x21a   : > { %v1320_v20 = vadd.f32 %v1319_v21, %v1318_v50  ;;  %v1103_v3 = vadd.f32 %v1102_v4, %v1101_v11  ;;  %v1536_v8 = vadd.f32 %v1526_v14, %v1524_v63  ;;  %v1337_v42 = vadd.f32 %v1301_v1, %v1299_v52 }
 0x21b   : > { %v1097_v23 = vrot.slane %v1096_v13, 1  ;;  %v1327_v44 = vadd.f32 %v1326_v60, %v1325_v10  ;;  %v1331_v2 = vrot.slane %v1330_v32, 4  ;;  %v1543_v46 = vadd.f32 %v1527_v12, %v1525_v5  ;;  %v3537_v47 = vpop.f32.mrb[36].mxu0 }
 0x21c   : > { %v1321_v22 = vrot.slane %v1320_v20, 1  ;;  %v1104_v26 = vrot.slane %v1103_v3, 1  ;;  %v1537_v30 = vrot.slane %v1536_v8, 4  ;;  %v1338_v55 = vrot.slane %v1337_v42, 4  ;;  %v3539_v45 = vpop.f32.mrb[30].mxu1  ;;  %v3541_v7 = vpop.f32.mrb[37].mxu0 }
 0x21d   : > { %v1098_v53 = vadd.f32 %v1097_v23, %v1096_v13  ;;  %v1328_v57 = vrot.slane %v1327_v44, 1  ;;  %v1332_v27 = vadd.f32 %v1331_v2, %v1330_v32  ;;  %v1544_v35 = vrot.slane %v1543_v46, 4  ;;  %v3543_v41 = vpop.f32.mrb[31].mxu1 }
 0x21e   : > { %v1322_v29 = vadd.f32 %v1321_v22, %v1320_v20  ;;  %v1105_v43 = vadd.f32 %v1104_v26, %v1103_v3  ;;  %v1538_v50 = vadd.f32 %v1537_v30, %v1536_v8  ;;  %v1339_v11 = vadd.f32 %v1338_v55, %v1337_v42 }
 0x21f   : > { %v1110_v63 = vadd.f32 %v1098_v53, %v3493_v28  ;;  %v1329_v52 = vadd.f32 %v1328_v57, %v1327_v44  ;;  %v1333_v16 = vrot.slane %v1332_v27, 2  ;;  %v1545_v10 = vadd.f32 %v1544_v35, %v1543_v46  ;;  %v3546_v5 = vpop.f32.mrb[38].mxu0 }
 0x220   : > { %v3549_v33 = vadd.f32 %v1322_v29, %v3508_v62  ;;  %v1111_v21 = vadd.f32 %v1105_v43, %v3496_v54  ;;  %v1539_v4 = vrot.slane %v1538_v50, 2  ;;  %v1340_v14 = vrot.slane %v1339_v11, 2  ;;  %v1519_v1 = vpop.f32.mrb[32].mxu1  ;;  %v3552_v13 = vpop.f32.mrb[39].mxu0 }
 0x221   : > { %v3555_v60 = vadd.f32 %v1329_v52, %v3515_v34  ;;  %v1334_v32 = vadd.f32 %v1333_v16, %v1332_v27  ;;  %v1546_v28 = vrot.slane %v1545_v10, 2  ;;  %v1528_v12 = vmul.f32 %v3517_v25, %v3393_v17  ;;  %v1521_v20 = vpop.f32.mrb[33].mxu1 }
 0x222   : > { %v1540_v3 = vadd.f32 %v1539_v4, %v1538_v50  ;;  %v1341_v8 = vadd.f32 %v1340_v14, %v1339_v11  ;;  %v1758_v62 = vmul.f32 %v3510_v31, %v3411_v0  ;;  %v1529_v54 = vmul.f32 %v3524_v51, %v3395_v19 }
 0x223   : > { %v1335_v42 = vrot.slane %v1334_v32, 1  ;;  %v1547_v23 = vadd.f32 %v1546_v28, %v1545_v10  ;;  %v1759_v34 = vmul.f32 %v3519_v15, %v3413_v56  ;;  %v1530_v44 = vmul.f32 %v1507_v18, %v3399_v36  ;;  %v3566_v2 = vpop.f32.mrb[40].mxu0 }
 0x224   : > { %v1541_v46 = vrot.slane %v1540_v3, 1  ;;  %v1342_v25 = vrot.slane %v1341_v8, 1  ;;  %v1760_v22 = vmul.f32 %v3530_v38, %v3418_v58  ;;  %v1531_v26 = vmul.f32 %v1509_v39, %v3405_v37  ;;  %v3571_v31 = vpop.f32.mrb[34].mxu1  ;;  %v3573_v30 = vpop.f32.mrb[41].mxu0 }
 0x225   : > { %v1336_v51 = vadd.f32 %v1335_v42, %v1334_v32  ;;  %v1548_v55 = vrot.slane %v1547_v23, 1  ;;  %v1550_v53 = vadd.f32 %v1530_v44, %v1528_v12  ;;  %v1761_v15 = vmul.f32 %v3534_v6, %v3421_v49  ;;  %v3577_v18 = vpop.f32.mrb[35].mxu1 }
 0x226   : > { %v1542_v57 = vadd.f32 %v1541_v46, %v1540_v3  ;;  %v1343_v27 = vadd.f32 %v1342_v25, %v1341_v8  ;;  %v1770_v35 = vadd.f32 %v1760_v22, %v1758_v62  ;;  %v1557_v29 = vadd.f32 %v1531_v26, %v1529_v54 }
 0x227   : > { %v3579_v43 = vadd.f32 %v1336_v51, %v1110_v63  ;;  %v1549_v38 = vadd.f32 %v1548_v55, %v1547_v23  ;;  %v1551_v39 = vrot.slane %v1550_v53, 4  ;;  %v1777_v50 = vadd.f32 %v1761_v15, %v1759_v34  ;;  %v3581_v11 = vpop.f32.mrb[42].mxu0 }
 0x228   : > { %v1578_v52 = vadd.f32 %v1542_v57, %v3512_v40  ;;  %v3584_v16 = vadd.f32 %v1343_v27, %v1111_v21  ;;  %v1771_v10 = vrot.slane %v1770_v35, 4  ;;  %v1558_v4 = vrot.slane %v1557_v29, 4  ;;  %v3586_v6 = vpop.f32.mrb[36].mxu1  ;;  %v3588_v14 = vpop.f32.mrb[43].mxu0 }
 0x229   : > { %v1579_v32 = vadd.f32 %v1549_v38, %v3521_v9  ;;  %v1552_v28 = vadd.f32 %v1551_v39, %v1550_v53  ;;  %v1778_v63 = vrot.slane %v1777_v50, 4  ;;  %v1532_v12 = vmul.f32 %v3539_v45, %v3393_v17  ;;  %v3593_v3 = vpop.f32.mrb[37].mxu1 }
 0x22a   : > { %v1772_v8 = vadd.f32 %v1771_v10, %v1770_v35  ;;  %v1559_v62 = vadd.f32 %v1558_v4, %v1557_v29  ;;  %v1762_v40 = vmul.f32 %v3537_v47, %v3411_v0  ;;  %v1533_v21 = vmul.f32 %v3543_v41, %v3395_v19 }
 0x22b   : > { %v1553_v54 = vrot.slane %v1552_v28, 2  ;;  %v1779_v42 = vadd.f32 %v1778_v63, %v1777_v50  ;;  %v1763_v9 = vmul.f32 %v3541_v7, %v3413_v56  ;;  %v1534_v23 = vmul.f32 %v1519_v1, %v3399_v36  ;;  %v3602_v34 = vpop.f32.mrb[44].mxu0 }
 0x22c   : > { %v1773_v17 = vrot.slane %v1772_v8, 2  ;;  %v1560_v45 = vrot.slane %v1559_v62, 2  ;;  %v1764_v44 = vmul.f32 %v3546_v5, %v3418_v58  ;;  %v1535_v46 = vmul.f32 %v1521_v20, %v3405_v37  ;;  %v3607_v47 = vpop.f32.mrb[38].mxu1  ;;  %v3609_v25 = vpop.f32.mrb[45].mxu0 }
 0x22d   : > { %v1554_v19 = vadd.f32 %v1553_v54, %v1552_v28  ;;  %v1780_v41 = vrot.slane %v1779_v42, 2  ;;  %v1564_v22 = vadd.f32 %v1534_v23, %v1532_v12  ;;  %v1765_v7 = vmul.f32 %v3552_v13, %v3421_v49  ;;  %v3613_v36 = vpop.f32.mrb[39].mxu1 }
 0x22e   : > { %v1774_v1 = vadd.f32 %v1773_v17, %v1772_v8  ;;  %v1561_v26 = vadd.f32 %v1560_v45, %v1559_v62  ;;  %v1784_v51 = vadd.f32 %v1764_v44, %v1762_v40  ;;  %v1571_v55 = vadd.f32 %v1535_v46, %v1533_v21 }
 0x22f   : > { %v1555_v53 = vrot.slane %v1554_v19, 1  ;;  %v1781_v5 = vadd.f32 %v1780_v41, %v1779_v42  ;;  %v1565_v15 = vrot.slane %v1564_v22, 4  ;;  %v1791_v37 = vadd.f32 %v1765_v7, %v1763_v9  ;;  %v3615_v20 = vpop.f32.mrb[46].mxu0 }
 0x230   : > { %v1775_v57 = vrot.slane %v1774_v1, 1  ;;  %v1562_v27 = vrot.slane %v1561_v26, 1  ;;  %v1785_v35 = vrot.slane %v1784_v51, 4  ;;  %v1572_v29 = vrot.slane %v1571_v55, 4  ;;  %v3617_v38 = vpop.f32.mrb[40].mxu1  ;;  %v3619_v39 = vpop.f32.mrb[47].mxu0 }
 0x231   : > { %v1556_v13 = vadd.f32 %v1555_v53, %v1554_v19  ;;  %v1782_v50 = vrot.slane %v1781_v5, 1  ;;  %v1566_v10 = vadd.f32 %v1565_v15, %v1564_v22  ;;  %v1792_v4 = vrot.slane %v1791_v37, 4  ;;  %v3621_v28 = vpop.f32.mrb[41].mxu1 }
 0x232   : > { %v1776_v63 = vadd.f32 %v1775_v57, %v1774_v1  ;;  %v1563_v12 = vadd.f32 %v1562_v27, %v1561_v26  ;;  %v1786_v8 = vadd.f32 %v1785_v35, %v1784_v51  ;;  %v1573_v62 = vadd.f32 %v1572_v29, %v1571_v55 }
 0x233   : > { %v1580_v40 = vadd.f32 %v1556_v13, %v3549_v33  ;;  %v1783_v21 = vadd.f32 %v1782_v50, %v1781_v5  ;;  %v1567_v54 = vrot.slane %v1566_v10, 2  ;;  %v1793_v42 = vadd.f32 %v1792_v4, %v1791_v37  ;;  %v3624_v9 = vpop.f32.mrb[48].mxu0 }
 0x234   : > { %v3626_v23 = vadd.f32 %v1776_v63, %v1578_v52  ;;  %v1581_v17 = vadd.f32 %v1563_v12, %v3555_v60  ;;  %v1787_v45 = vrot.slane %v1786_v8, 2  ;;  %v1574_v44 = vrot.slane %v1573_v62, 2  ;;  %v3629_v46 = vpop.f32.mrb[42].mxu1  ;;  %v3631_v19 = vpop.f32.mrb[49].mxu0 }
 0x235   : > { %v3633_v41 = vadd.f32 %v1783_v21, %v1579_v32  ;;  %v1568_v22 = vadd.f32 %v1567_v54, %v1566_v10  ;;  %v1794_v7 = vrot.slane %v1793_v42, 2  ;;  %v1766_v33 = vmul.f32 %v3566_v2, %v3411_v0  ;;  %v3637_v1 = vpop.f32.mrb[43].mxu1 }
 0x236   : > { %v1788_v26 = vadd.f32 %v1787_v45, %v1786_v8  ;;  %v1575_v52 = vadd.f32 %v1574_v44, %v1573_v62  ;;  %v1996_v60 = vmul.f32 %v3571_v31, %v3423_v61  ;;  %v1767_v51 = vmul.f32 %v3573_v30, %v3413_v56 }
 0x237   : > { %v1569_v55 = vrot.slane %v1568_v22, 1  ;;  %v1795_v53 = vadd.f32 %v1794_v7, %v1793_v42  ;;  %v1997_v32 = vmul.f32 %v3577_v18, %v3430_v59  ;;  %v1768_v5 = vmul.f32 %v3581_v11, %v3418_v58  ;;  %v3647_v15 = vpop.f32.mrb[50].mxu0  ;;  %v3808_v7 = vld [vmem:[#allocation2_spill] sm:$0xff] }
 0x238   : > { %v1789_v0 = vrot.slane %v1788_v26, 1  ;;  %v1576_v2 = vrot.slane %v1575_v52, 1  ;;  %v1998_v37 = vmul.f32 %v3586_v6, %v3432_v24  ;;  %v1769_v31 = vmul.f32 %v3588_v14, %v3421_v49  ;;  %v3653_v57 = vpop.f32.mrb[44].mxu1  ;;  %v3655_v56 = vpop.f32.mrb[51].mxu0 }
 0x239   : > { %v1570_v30 = vadd.f32 %v1569_v55, %v1568_v22  ;;  %v1796_v27 = vrot.slane %v1795_v53, 1  ;;  %v1798_v18 = vadd.f32 %v1768_v5, %v1766_v33  ;;  %v1999_v58 = vmul.f32 %v3593_v3, %v3435_v48  ;;  %v3659_v11 = vpop.f32.mrb[45].mxu1 }
 0x23a   : > { %v1790_v35 = vadd.f32 %v1789_v0, %v1788_v26  ;;  %v1577_v29 = vadd.f32 %v1576_v2, %v1575_v52  ;;  %v2008_v13 = vadd.f32 %v1998_v37, %v1996_v60  ;;  %v1805_v50 = vadd.f32 %v1769_v31, %v1767_v51  ;;  %v3809_v60 = vld [vmem:[#allocation3_spill] sm:$0xff]  ;;  %v3811_v31 = vld [vmem:[#allocation5_spill] sm:$0xff] }
 0x23b   : > { %v1582_v6 = vadd.f32 %v1570_v30, %v3579_v43  ;;  %v1797_v10 = vadd.f32 %v1796_v27, %v1795_v53  ;;  %v1799_v49 = vrot.slane %v1798_v18, 4  ;;  %v2015_v14 = vadd.f32 %v1999_v58, %v1997_v32  ;;  %v3662_v4 = vpop.f32.mrb[52].mxu0  ;;  %v3810_v32 = vld [vmem:[#allocation4_spill] sm:$0xff] }
 0x23c   : > { %v3664_v63 = vadd.f32 %v1790_v35, %v1580_v40  ;;  %v1583_v12 = vadd.f32 %v1577_v29, %v3584_v16  ;;  %v2009_v8 = vrot.slane %v2008_v13, 4  ;;  %v1806_v62 = vrot.slane %v1805_v50, 4  ;;  %v3667_v3 = vpop.f32.mrb[46].mxu1  ;;  %v3669_v21 = vpop.f32.mrb[53].mxu0 }
 0x23d   : > { %v3671_v54 = vadd.f32 %v1797_v10, %v1581_v17  ;;  %v1800_v42 = vadd.f32 %v1799_v49, %v1798_v18  ;;  %v2016_v45 = vrot.slane %v2015_v14, 4  ;;  %v2000_v43 = vmul.f32 %v3607_v47, %v3423_v61  ;;  %v3675_v44 = vpop.f32.mrb[47].mxu1 }
 0x23e   : > { %v2010_v22 = vadd.f32 %v2009_v8, %v2008_v13  ;;  %v1807_v40 = vadd.f32 %v1806_v62, %v1805_v50  ;;  %v2232_v16 = vmul.f32 %v3602_v34, %v3808_v7  ;;  %v2001_v33 = vmul.f32 %v3613_v36, %v3430_v59 }
 0x23f   : > { %v1801_v26 = vrot.slane %v1800_v42, 2  ;;  %v2017_v52 = vadd.f32 %v2016_v45, %v2015_v14  ;;  %v2233_v17 = vmul.f32 %v3609_v25, %v3809_v60  ;;  %v2002_v51 = vmul.f32 %v3617_v38, %v3432_v24  ;;  %v3685_v55 = vpop.f32.mrb[54].mxu0 }
 0x240   : > { %v2011_v47 = vrot.slane %v2010_v22, 2  ;;  %v1808_v53 = vrot.slane %v1807_v40, 2  ;;  %v2234_v5 = vmul.f32 %v3615_v20, %v3810_v32  ;;  %v2003_v34 = vmul.f32 %v3621_v28, %v3435_v48  ;;  %v3691_v0 = vpop.f32.mrb[48].mxu1  ;;  %v3693_v36 = vpop.f32.mrb[55].mxu0 }
 0x241   : > { %v1802_v2 = vadd.f32 %v1801_v26, %v1800_v42  ;;  %v2018_v37 = vrot.slane %v2017_v52, 2  ;;  %v2022_v25 = vadd.f32 %v2002_v51, %v2000_v43  ;;  %v2235_v38 = vmul.f32 %v3619_v39, %v3811_v31  ;;  %v3697_v30 = vpop.f32.mrb[49].mxu1 }
 0x242   : > { %v2012_v27 = vadd.f32 %v2011_v47, %v2010_v22  ;;  %v1809_v18 = vadd.f32 %v1808_v53, %v1807_v40  ;;  %v2244_v58 = vadd.f32 %v2234_v5, %v2232_v16  ;;  %v2029_v35 = vadd.f32 %v2003_v34, %v2001_v33 }
 0x243   : > { %v1803_v20 = vrot.slane %v1802_v2, 1  ;;  %v2019_v29 = vadd.f32 %v2018_v37, %v2017_v52  ;;  %v2023_v13 = vrot.slane %v2022_v25, 4  ;;  %v2251_v28 = vadd.f32 %v2235_v38, %v2233_v17 }
 0x244   : > { %v2013_v50 = vrot.slane %v2012_v27, 1  ;;  %v1810_v10 = vrot.slane %v1809_v18, 1  ;;  %v2245_v49 = vrot.slane %v2244_v58, 4  ;;  %v2030_v14 = vrot.slane %v2029_v35, 4  ;;  %v3699_v8 = vpop.f32.mrb[50].mxu1 }
 0x245   : > { %v1804_v62 = vadd.f32 %v1803_v20, %v1802_v2  ;;  %v2020_v42 = vrot.slane %v2019_v29, 1  ;;  %v2024_v45 = vadd.f32 %v2023_v13, %v2022_v25  ;;  %v2252_v39 = vrot.slane %v2251_v28, 4  ;;  %v3701_v43 = vpop.f32.mrb[51].mxu1 }
 0x246   : > { %v2014_v22 = vadd.f32 %v2013_v50, %v2012_v27  ;;  %v1811_v40 = vadd.f32 %v1810_v10, %v1809_v18  ;;  %v2246_v16 = vadd.f32 %v2245_v49, %v2244_v58  ;;  %v2031_v33 = vadd.f32 %v2030_v14, %v2029_v35 }
 0x247   : > { %v3703_v26 = vadd.f32 %v1804_v62, %v1582_v6  ;;  %v2021_v52 = vadd.f32 %v2020_v42, %v2019_v29  ;;  %v2025_v17 = vrot.slane %v2024_v45, 2  ;;  %v2253_v51 = vadd.f32 %v2252_v39, %v2251_v28 }
 0x248   : > { %v2050_v47 = vadd.f32 %v2014_v22, %v3626_v23  ;;  %v3706_v53 = vadd.f32 %v1811_v40, %v1583_v12  ;;  %v2247_v5 = vrot.slane %v2246_v16, 2  ;;  %v2032_v34 = vrot.slane %v2031_v33, 2  ;;  %v3708_v2 = vpop.f32.mrb[52].mxu1 }
 0x249   : > { %v2051_v37 = vadd.f32 %v2021_v52, %v3633_v41  ;;  %v2026_v25 = vadd.f32 %v2025_v17, %v2024_v45  ;;  %v2254_v38 = vrot.slane %v2253_v51, 2  ;;  %v2004_v27 = vmul.f32 %v3629_v46, %v3423_v61  ;;  %v3713_v6 = vpop.f32.mrb[53].mxu1 }
 0x24a   : > { %v2248_v18 = vadd.f32 %v2247_v5, %v2246_v16  ;;  %v2033_v58 = vadd.f32 %v2032_v34, %v2031_v33  ;;  %v2236_v23 = vmul.f32 %v3624_v9, %v3808_v7  ;;  %v2005_v12 = vmul.f32 %v3637_v1, %v3430_v59  ;;  %v3812_v5 = vld [vmem:[#allocation6_spill] sm:$0xff] }
 0x24b   : > { %v2027_v35 = vrot.slane %v2026_v25, 1  ;;  %v2255_v20 = vadd.f32 %v2254_v38, %v2253_v51  ;;  %v2237_v41 = vmul.f32 %v3631_v19, %v3809_v60  ;;  %v2006_v29 = vmul.f32 %v3653_v57, %v3432_v24  ;;  %v3813_v38 = vld [vmem:[#allocation8_spill] sm:$0xff] }
 0x24c   : > { %v2249_v13 = vrot.slane %v2248_v18, 1  ;;  %v2034_v61 = vrot.slane %v2033_v58, 1  ;;  %v2238_v46 = vmul.f32 %v3647_v15, %v3810_v32  ;;  %v2007_v28 = vmul.f32 %v3659_v11, %v3435_v48  ;;  %v3727_v9 = vpop.f32.mrb[54].mxu1 }
 0x24d   : > { %v2028_v50 = vadd.f32 %v2027_v35, %v2026_v25  ;;  %v2256_v59 = vrot.slane %v2255_v20, 1  ;;  %v2036_v1 = vadd.f32 %v2006_v29, %v2004_v27  ;;  %v2239_v10 = vmul.f32 %v3655_v56, %v3811_v31  ;;  %v3731_v19 = vpop.f32.mrb[55].mxu1 }
 0x24e   : > { %v2250_v49 = vadd.f32 %v2249_v13, %v2248_v18  ;;  %v2035_v24 = vadd.f32 %v2034_v61, %v2033_v58  ;;  %v2258_v57 = vadd.f32 %v2238_v46, %v2236_v23  ;;  %v2043_v14 = vadd.f32 %v2007_v28, %v2005_v12 }
 0x24f   : > { %v2052_v62 = vadd.f32 %v2028_v50, %v3664_v63  ;;  %v2257_v15 = vadd.f32 %v2256_v59, %v2255_v20  ;;  %v2037_v42 = vrot.slane %v2036_v1, 4  ;;  %v2265_v45 = vadd.f32 %v2239_v10, %v2237_v41 }
 0x250   : > { %v3734_v48 = vadd.f32 %v2250_v49, %v2050_v47  ;;  %v2053_v11 = vadd.f32 %v2035_v24, %v3671_v54  ;;  %v2259_v39 = vrot.slane %v2258_v57, 4  ;;  %v2044_v22 = vrot.slane %v2043_v14, 4  ;;  %v3737_v40 = vpop.f32.mrb[56].mxu1 }
 0x251   : > { %v3739_v56 = vadd.f32 %v2257_v15, %v2051_v37  ;;  %v2038_v16 = vadd.f32 %v2037_v42, %v2036_v1  ;;  %v2266_v33 = vrot.slane %v2265_v45, 4  ;;  %v2240_v52 = vmul.f32 %v3662_v4, %v3808_v7  ;;  %v3743_v17 = vpop.f32.mrb[57].mxu1  ;;  %v3814_v7 = vld [vmem:[#allocation7_spill] sm:$0xff] }
 0x252   : > { %v2260_v63 = vadd.f32 %v2259_v39, %v2258_v57  ;;  %v2045_v51 = vadd.f32 %v2044_v22, %v2043_v14  ;;  %v2470_v47 = vmul.f32 %v3667_v3, %v3812_v5  ;;  %v2241_v54 = vmul.f32 %v3669_v21, %v3809_v60  ;;  %v3815_v21 = vld [vmem:[#allocation9_spill] sm:$0xff] }
 0x253   : > { %v2039_v34 = vrot.slane %v2038_v16, 2  ;;  %v2267_v25 = vadd.f32 %v2266_v33, %v2265_v45  ;;  %v2471_v37 = vmul.f32 %v3675_v44, %v3813_v38  ;;  %v2242_v27 = vmul.f32 %v3685_v55, %v3810_v32 }
 0x254   : > { %v2261_v18 = vrot.slane %v2260_v63, 2  ;;  %v2046_v4 = vrot.slane %v2045_v51, 2  ;;  %v2472_v58 = vmul.f32 %v3691_v0, %v3814_v7  ;;  %v2243_v23 = vmul.f32 %v3693_v36, %v3811_v31 }
 0x255   : > { %v2040_v3 = vadd.f32 %v2039_v34, %v2038_v16  ;;  %v2268_v12 = vrot.slane %v2267_v25, 2  ;;  %v2272_v35 = vadd.f32 %v2242_v27, %v2240_v52  ;;  %v2473_v60 = vmul.f32 %v3697_v30, %v3815_v21 }
 0x256   : > { %v2262_v20 = vadd.f32 %v2261_v18, %v2260_v63  ;;  %v2047_v41 = vadd.f32 %v2046_v4, %v2045_v51  ;;  %v2482_v44 = vadd.f32 %v2472_v58, %v2470_v47  ;;  %v2279_v29 = vadd.f32 %v2243_v23, %v2241_v54 }
 0x257   : > { %v2041_v13 = vrot.slane %v2040_v3, 1  ;;  %v2269_v55 = vadd.f32 %v2268_v12, %v2267_v25  ;;  %v2273_v32 = vrot.slane %v2272_v35, 4  ;;  %v2489_v61 = vadd.f32 %v2473_v60, %v2471_v37 }
 0x258   : > { %v2263_v46 = vrot.slane %v2262_v20, 1  ;;  %v2048_v28 = vrot.slane %v2047_v41, 1  ;;  %v2483_v0 = vrot.slane %v2482_v44, 4  ;;  %v2280_v50 = vrot.slane %v2279_v29, 4 }
 0x259   : > { %v2042_v59 = vadd.f32 %v2041_v13, %v2040_v3  ;;  %v2270_v36 = vrot.slane %v2269_v55, 1  ;;  %v2274_v31 = vadd.f32 %v2273_v32, %v2272_v35  ;;  %v2490_v1 = vrot.slane %v2489_v61, 4 }
 0x25a   : > { %v2264_v10 = vadd.f32 %v2263_v46, %v2262_v20  ;;  %v2049_v49 = vadd.f32 %v2048_v28, %v2047_v41  ;;  %v2484_v24 = vadd.f32 %v2483_v0, %v2482_v44  ;;  %v2281_v30 = vadd.f32 %v2280_v50, %v2279_v29 }
 0x25b   : > { %v2054_v57 = vadd.f32 %v2042_v59, %v3703_v26  ;;  %v2271_v14 = vadd.f32 %v2270_v36, %v2269_v55  ;;  %v2275_v15 = vrot.slane %v2274_v31, 2  ;;  %v2491_v42 = vadd.f32 %v2490_v1, %v2489_v61 }
 0x25c   : > { %v2288_v45 = vadd.f32 %v2264_v10, %v2052_v62  ;;  %v2055_v39 = vadd.f32 %v2049_v49, %v3706_v53  ;;  %v2485_v22 = vrot.slane %v2484_v24, 2  ;;  %v2282_v16 = vrot.slane %v2281_v30, 2 }
 0x25d   : > { %v2289_v33 = vadd.f32 %v2271_v14, %v2053_v11  ;;  %v2276_v52 = vadd.f32 %v2275_v15, %v2274_v31  ;;  %v2492_v63 = vrot.slane %v2491_v42, 2  ;;  %v2474_v51 = vmul.f32 %v3699_v8, %v3812_v5 }
 0x25e   : > { %v2486_v47 = vadd.f32 %v2485_v22, %v2484_v24  ;;  %v2283_v54 = vadd.f32 %v2282_v16, %v2281_v30  ;;  %v2475_v34 = vmul.f32 %v3701_v43, %v3813_v38  ;;  %v2476_v26 = vmul.f32 %v3708_v2, %v3814_v7 }
 0x25f   : > { %v2277_v25 = vrot.slane %v2276_v52, 1  ;;  %v2493_v62 = vadd.f32 %v2492_v63, %v2491_v42  ;;  %v2477_v53 = vmul.f32 %v3713_v6, %v3815_v21  ;;  %v2478_v8 = vmul.f32 %v3727_v9, %v3812_v5  ;;  %v2534_v9 = vpop.permute.xlu1 %2533 }
 0x260   : > { %v2487_v37 = vrot.slane %v2486_v47, 1  ;;  %v2284_v11 = vrot.slane %v2283_v54, 1  ;;  %v2496_v27 = vadd.f32 %v2476_v26, %v2474_v51  ;;  %v2479_v2 = vmul.f32 %v3731_v19, %v3813_v38 }
 0x261   : > { %v2278_v18 = vadd.f32 %v2277_v25, %v2276_v52  ;;  %v2494_v4 = vrot.slane %v2493_v62, 1  ;;  %v2503_v58 = vadd.f32 %v2477_v53, %v2475_v34  ;;  %v2480_v6 = vmul.f32 %v3737_v40, %v3814_v7 }
 0x262   : > { %v2488_v23 = vadd.f32 %v2487_v37, %v2486_v47  ;;  %v2285_v3 = vadd.f32 %v2284_v11, %v2283_v54  ;;  %v2497_v43 = vrot.slane %v2496_v27, 4  ;;  %v2481_v29 = vmul.f32 %v3743_v17, %v3815_v21 }
 0x263   : > { %v2290_v12 = vadd.f32 %v2278_v18, %v2054_v57  ;;  %v2495_v35 = vadd.f32 %v2494_v4, %v2493_v62  ;;  %v2504_v60 = vrot.slane %v2503_v58, 4  ;;  %v2510_v55 = vadd.f32 %v2480_v6, %v2478_v8 }
 0x264   : > { %v2524_v20 = vadd.f32 %v2488_v23, %v3734_v48  ;;  %v2291_v41 = vadd.f32 %v2285_v3, %v2055_v39  ;;  %v2498_v44 = vadd.f32 %v2497_v43, %v2496_v27  ;;  %v2517_v38 = vadd.f32 %v2481_v29, %v2479_v2 }
 0x265   : > { %v2525_v5 = vadd.f32 %v2495_v35, %v3739_v56  ;;  %v2505_v13 = vadd.f32 %v2504_v60, %v2503_v58  ;;  %v2511_v28 = vrot.slane %v2510_v55, 4  ;;  %v2535_v49 = vrot.slane %v2534_v9, 1 }
 0x266   : > { %v2540_v32 = vadd.f32 %v2534_v9, %v2524_v20  ;;  %v2499_v19 = vrot.slane %v2498_v44, 2  ;;  %v2518_v40 = vrot.slane %v2517_v38, 4  ;;  %v2536_v52 = vrot.slane %v2534_v9, 2 }
 0x267   : > { %v2541_v61 = vadd.f32 %v2534_v9, %v2525_v5  ;;  %v2506_v46 = vrot.slane %v2505_v13, 2  ;;  %v2512_v50 = vadd.f32 %v2511_v28, %v2510_v55 }
 0x268   : > { %v2500_v0 = vadd.f32 %v2499_v19, %v2498_v44  ;;  %v2519_v36 = vadd.f32 %v2518_v40, %v2517_v38 }
 0x269   : > { %v2552_v7 = vcombine.low %v2540_v32, %v2541_v61  ;;  %v2507_v48 = vadd.f32 %v2506_v46, %v2505_v13  ;;  %v2513_v17 = vrot.slane %v2512_v50, 2 }
 0x26a   : > { %v2501_v59 = vrot.slane %v2500_v0, 1  ;;  %v2520_v1 = vrot.slane %v2519_v36, 2 }
 0x26b   : > { %v2508_v31 = vrot.slane %v2507_v48, 1  ;;  %v2514_v10 = vadd.f32 %v2513_v17, %v2512_v50 }
 0x26c   : > { %v2502_v21 = vadd.f32 %v2501_v59, %v2500_v0  ;;  %v2521_v30 = vadd.f32 %v2520_v1, %v2519_v36 }
 0x26d   : > { %v2509_v56 = vadd.f32 %v2508_v31, %v2507_v48  ;;  %v2515_v14 = vrot.slane %v2514_v10, 1 }
 0x26e   : > { %v2526_v24 = vadd.f32 %v2502_v21, %v2288_v45  ;;  %v2522_v42 = vrot.slane %v2521_v30, 1 }
 0x26f   : > { %v2527_v57 = vadd.f32 %v2509_v56, %v2289_v33  ;;  %v2516_v22 = vadd.f32 %v2515_v14, %v2514_v10 }
 0x270   : > { %v2542_v15 = vadd.f32 %v2535_v49, %v2526_v24  ;;  %v2523_v16 = vadd.f32 %v2522_v42, %v2521_v30 }
 0x271   : > { %v2543_v39 = vadd.f32 %v2535_v49, %v2527_v57  ;;  %v2528_v51 = vadd.f32 %v2516_v22, %v2290_v12 }
 0x272   : > { %v2529_v47 = vadd.f32 %v2523_v16, %v2291_v41 }
 0x273   : > { %v2553_v63 = vcombine.low %v2542_v15, %v2543_v39  ;;  %v2544_v34 = vadd.f32 %v2536_v52, %v2528_v51 }
 0x274   : > { %v2545_v26 = vadd.f32 %v2536_v52, %v2529_v47 }
 0x275   : > { %v2555_v54 = vrot.slane %v2553_v63, 7 }
 0x276   : > { %v2554_v33 = vcombine.low %v2544_v34, %v2545_v26 }
 0x277   : > { %v2557_v25 = vsel %vm2556_vm5, %v2555_v54, %v2552_v7 }
 0x278   : > { %v2559_v45 = vsel %vm2558_vm6, %v2555_v54, %v2557_v25  ;;  %v2560_v62 = vrot.slane %v2554_v33, 6 }
 0x27a   : > { %v2562_v53 = vsel %vm2561_vm7, %v2560_v62, %v2559_v45 }
 0x27b   : > { %v2564_v37 = vsel %vm2563_vm8, %v2560_v62, %v2562_v53 }
 0x27c   : > { %2566 = vst [vmem:[%s244_s22] sm:$0x77] %v2564_v37 }
 0x27d PF: > { %s15_s18 = sadd.s32 1, %s2823_s18  }
 0x27e   : > { %p12_p4 = scmp.ge.s32.totalorder %s15_s18, 4  }
 0x280   :  { %14 = sbr.rel (!%p12_p4) target bundleno = 1 (0x1), region = 81 }

</bundles_post_ra>
